<compile_context>
chip_gen: v6e
topology: v6e:2x2x1
jax: 0.10.0
libtpu: 0.0.40
codegen_flags: <defaults>
</compile_context>

<pallas_src>
import functools

import jax
import jax.numpy as jnp
from jax.experimental import pallas as pl
from jax.experimental.pallas import tpu as pltpu


# Matmul operand dtype (accumulation stays f32 via preferred_element_type); elementwise
# softmax / ReLU / residual math stays f32.
MXU_DTYPE = jnp.bfloat16


# ----------------------------------------------------------------------------
# helpers
# ----------------------------------------------------------------------------
def _round_up(x, m):
    return (x + m - 1) // m * m


def _pick_tile(n, max_tile):
    """Largest divisor of n that is a multiple of 8 and <= max_tile; fallback n.

    Falling back to a full-N block is always correct (block == full dim), it just
    costs more VMEM for awkward N (odd point counts are unusual for point clouds).
    """
    best = 0
    for t in range(8, min(n, max_tile) + 1, 8):
        if n % t == 0:
            best = t
    return best if best > 0 else n


# ----------------------------------------------------------------------------
# Pallas kernels
# ----------------------------------------------------------------------------
def conv1_kernel(x_ref, w1_ref, b1_ref, w2_ref, b2_ref, feat_ref, fmax_ref):
    """Fused per-point MLP (Cin -> 32 ReLU -> 64) + fused per-batch max over points."""
    mt = pl.program_id(1)

    x = x_ref[0].astype(MXU_DTYPE)                                   # (TM, Cin_pad)
    h = jnp.dot(x, w1_ref[...].astype(MXU_DTYPE),
                preferred_element_type=jnp.float32) + b1_ref[...]
    h = jnp.maximum(h, 0.0)
    y = jnp.dot(h.astype(MXU_DTYPE), w2_ref[...].astype(MXU_DTYPE),
                preferred_element_type=jnp.float32) + b2_ref[...]     # (TM, 64)
    feat_ref[0] = y

    @pl.when(mt == 0)
    def _():
        fmax_ref[...] = jnp.full(fmax_ref.shape, -jnp.inf, dtype=fmax_ref.dtype)

    fmax_ref[0] = jnp.maximum(fmax_ref[0], jnp.max(y, axis=0, keepdims=True))


def conv2max_kernel(x_ref, w1_ref, b1_ref, w2_ref, b2_ref, fmax_ref):
    """Fused per-point MLP (128 -> 128 ReLU -> 256); only the per-batch max is emitted."""
    mt = pl.program_id(1)

    x = x_ref[0].astype(MXU_DTYPE)                                    # (TM, 128)
    h = jnp.dot(x, w1_ref[...].astype(MXU_DTYPE),
                preferred_element_type=jnp.float32) + b1_ref[...]
    h = jnp.maximum(h, 0.0)
    y = jnp.dot(h.astype(MXU_DTYPE), w2_ref[...].astype(MXU_DTYPE),
                preferred_element_type=jnp.float32) + b2_ref[...]     # (TM, 256)

    @pl.when(mt == 0)
    def _():
        fmax_ref[...] = jnp.full(fmax_ref.shape, -jnp.inf, dtype=fmax_ref.dtype)

    fmax_ref[0] = jnp.maximum(fmax_ref[0], jnp.max(y, axis=0, keepdims=True))


def attn_fused_kernel(feat_ref, fg_ref, wf_ref, bf_ref, wg_ref, bg_ref,
                      wh_ref, bh_ref, gamma_ref, out_ref, f_sc, *, tm):
    """Fully fused attention_unit.

    feat_ref : (1, N, 64)  per-batch resident feature block (f32)
    fg_ref   : (1, 1, 64)  per-batch global-max feature row (residual second half)
    w*_ref   : top-half (64, Cout) projection weights (global half folded into b*_ref)
    b*_ref   : (1, 1, Cout) per-batch effective biases
    gamma    : SMEM scalar
    out_ref  : (1, N, 128) output block, accumulator-resident across the m axis
    f_sc     : (N, 32) VMEM scratch holding f = ReLU(feat_cat @ Wf + bf), built once/batch
    """
    mt = pl.program_id(1)
    n = feat_ref.shape[1]

    @pl.when(mt == 0)
    def _init():
        feat_all = feat_ref[0].astype(MXU_DTYPE)                      # (N, 64)
        f = jnp.dot(feat_all, wf_ref[...].astype(MXU_DTYPE),
                    preferred_element_type=jnp.float32) + bf_ref[0]
        f_sc[...] = jnp.maximum(f, 0.0)                               # (N, 32)
        out_ref[...] = jnp.zeros(out_ref.shape, out_ref.dtype)

    start = pl.multiple_of(mt * tm, 8)
    feat_tile = feat_ref[0, pl.ds(start, tm), :].astype(MXU_DTYPE)    # (TM, 64)

    g = jnp.dot(feat_tile, wg_ref[...].astype(MXU_DTYPE),
                preferred_element_type=jnp.float32) + bg_ref[0]
    g = jnp.maximum(g, 0.0)                                           # (TM, 32)
    h = jnp.dot(feat_tile, wh_ref[...].astype(MXU_DTYPE),
                preferred_element_type=jnp.float32) + bh_ref[0]
    h = jnp.maximum(h, 0.0)                                           # (TM, 128)

    # s[i, j] = g[i] . f[j]   (PyTorch softmax over dim=2 == over j)
    s = jax.lax.dot_general(g.astype(MXU_DTYPE), f_sc[...].astype(MXU_DTYPE),
                            (((1,), (1,)), ((), ())),
                            preferred_element_type=jnp.float32)       # (TM, N)
    m = jnp.max(s, axis=-1, keepdims=True)
    e = jnp.exp(s - m)                                                # unnormalized softmax
    inv_l = pl.reciprocal(jnp.sum(e, axis=-1, keepdims=True), approx=True)   # (TM, 1)
    h_scaled = h * inv_l                                              # fold 1/l into h rows

    # out[j, c] += sum_i beta[i, j] * h[i, c]
    out_ref[0] += jax.lax.dot_general(
        e.astype(MXU_DTYPE), h_scaled.astype(MXU_DTYPE),
        (((0,), (0,)), ((), ())), preferred_element_type=jnp.float32)  # (N, 128)

    @pl.when(mt == pl.num_programs(1) - 1)
    def _final():
        # residual = feat_cat = [feat | feat_global broadcast]; epilogue in place.
        res = jnp.concatenate(
            [feat_ref[0], jnp.broadcast_to(fg_ref[0], (n, fg_ref.shape[2]))], axis=-1)
        out_ref[0] = gamma_ref[0, 0] * out_ref[0] + res


# ----------------------------------------------------------------------------
# Pallas wrappers
# ----------------------------------------------------------------------------
def pallas_conv1(x, w1, b1, w2, b2, *, max_tile=2048):
    """x: (B, N, Cin) -> (feat (B,N,64), feat_global (B,64)) with fused max-pool."""
    B, N, Cin = x.shape
    H = w1.shape[1]
    Cout = w2.shape[1]
    # Pad the tiny channel dim once on the host (lane-sparse first layer fix).
    Cp = _round_up(max(Cin, 8), 8)
    if Cp != Cin:
        x = jnp.pad(x, ((0, 0), (0, 0), (0, Cp - Cin)))
        w1 = jnp.pad(w1, ((0, Cp - Cin), (0, 0)))
    TM = _pick_tile(N, max_tile)
    n_mt = N // TM

    feat, fmax = pl.pallas_call(
        conv1_kernel,
        out_shape=(jax.ShapeDtypeStruct((B, N, Cout), jnp.float32),
                   jax.ShapeDtypeStruct((B, 1, Cout), jnp.float32)),
        grid=(B, n_mt),
        in_specs=[
            pl.BlockSpec((1, TM, Cp), lambda b, m: (b, m, 0)),   # points: row tiles
            pl.BlockSpec((Cp, H), lambda b, m: (0, 0)),          # W1 VMEM-resident
            pl.BlockSpec((1, H), lambda b, m: (0, 0)),
            pl.BlockSpec((H, Cout), lambda b, m: (0, 0)),        # W2 VMEM-resident
            pl.BlockSpec((1, Cout), lambda b, m: (0, 0)),
        ],
        out_specs=(pl.BlockSpec((1, TM, Cout), lambda b, m: (b, m, 0)),
                   pl.BlockSpec((1, 1, Cout), lambda b, m: (b, 0, 0))),   # max accumulator
        compiler_params=pltpu.CompilerParams(
            dimension_semantics=("parallel", "arbitrary")),
    )(x, w1, b1.reshape(1, H), w2, b2.reshape(1, Cout))
    return feat, fmax.reshape(B, Cout)


def pallas_conv2_max(x, w1, b1, w2, b2, *, max_tile=1024):
    """x: (B, N, 128) -> per-batch max of the 2-layer MLP output, shape (B, 256)."""
    B, N, Cin = x.shape
    H = w1.shape[1]
    Cout = w2.shape[1]
    TM = _pick_tile(N, max_tile)
    n_mt = N // TM

    fmax = pl.pallas_call(
        conv2max_kernel,
        out_shape=jax.ShapeDtypeStruct((B, 1, Cout), jnp.float32),
        grid=(B, n_mt),
        in_specs=[
            pl.BlockSpec((1, TM, Cin), lambda b, m: (b, m, 0)),
            pl.BlockSpec((Cin, H), lambda b, m: (0, 0)),
            pl.BlockSpec((1, H), lambda b, m: (0, 0)),
            pl.BlockSpec((H, Cout), lambda b, m: (0, 0)),
            pl.BlockSpec((1, Cout), lambda b, m: (0, 0)),
        ],
        out_specs=pl.BlockSpec((1, 1, Cout), lambda b, m: (b, 0, 0)),
        compiler_params=pltpu.CompilerParams(
            dimension_semantics=("parallel", "arbitrary")),
    )(x, w1, b1.reshape(1, H), w2, b2.reshape(1, Cout))
    return fmax.reshape(B, Cout)


def pallas_attention_fused(feat, feat_global, wf, bf, wg, bg, wh, bh, gamma,
                           *, max_tile=256):
    """Fused attention_unit on channels-last features.

    feat: (B, N, 64), feat_global: (B, 64). feat_cat is never built: the global half's
    contribution to each projection is a per-batch row folded into an effective bias,
    and the residual is reconstructed inside the kernel epilogue.
    Returns gamma * attention(feat_cat) + feat_cat  ->  (B, N, 128).
    """
    B, N, C1 = feat.shape            # C1 = 64
    Cq = wf.shape[1]                 # 32
    C = wh.shape[1]                  # 128
    TM = _pick_tile(N, max_tile)
    n_mt = N // TM

    # Fold the broadcast global half of feat_cat into per-batch effective biases (f32).
    bf_eff = (feat_global @ wf[C1:] + bf).reshape(B, 1, Cq)
    bg_eff = (feat_global @ wg[C1:] + bg).reshape(B, 1, Cq)
    bh_eff = (feat_global @ wh[C1:] + bh).reshape(B, 1, C)
    wfA, wgA, whA = wf[:C1], wg[:C1], wh[:C1]
    fg3 = feat_global.reshape(B, 1, C1)
    gamma_smem = jnp.asarray(gamma, jnp.float32).reshape(1, 1)

    return pl.pallas_call(
        functools.partial(attn_fused_kernel, tm=TM),
        out_shape=jax.ShapeDtypeStruct((B, N, C), jnp.float32),
        grid=(B, n_mt),
        in_specs=[
            pl.BlockSpec((1, N, C1), lambda b, m: (b, 0, 0)),    # feat: resident per batch
            pl.BlockSpec((1, 1, C1), lambda b, m: (b, 0, 0)),    # feat_global row
            pl.BlockSpec((C1, Cq), lambda b, m: (0, 0)),         # Wf (top half)
            pl.BlockSpec((1, 1, Cq), lambda b, m: (b, 0, 0)),    # bf_eff
            pl.BlockSpec((C1, Cq), lambda b, m: (0, 0)),         # Wg (top half)
            pl.BlockSpec((1, 1, Cq), lambda b, m: (b, 0, 0)),    # bg_eff
            pl.BlockSpec((C1, C), lambda b, m: (0, 0)),          # Wh (top half)
            pl.BlockSpec((1, 1, C), lambda b, m: (b, 0, 0)),     # bh_eff
            pl.BlockSpec(memory_space=pltpu.MemorySpace.SMEM),   # gamma scalar
        ],
        out_specs=pl.BlockSpec((1, N, C), lambda b, m: (b, 0, 0)),   # accumulator-resident
        scratch_shapes=[pltpu.VMEM((N, Cq), jnp.float32)],           # f, built once/batch
        compiler_params=pltpu.CompilerParams(
            dimension_semantics=("parallel", "arbitrary"),
            vmem_limit_bytes=48 * 1024 * 1024),
    )(feat, fg3, wfA, bf_eff, wgA, bg_eff, whA, bh_eff, gamma_smem)


# ----------------------------------------------------------------------------
# Discriminator forward (accepts / returns PyTorch layout)
# ----------------------------------------------------------------------------
def discriminator_fwd(inputs, p):
    """inputs: (B, Cin, N) -> output: (B, 1)."""
    B, Cin, N = inputs.shape

    x_cl = jnp.transpose(inputs, (0, 2, 1))                              # (B, N, Cin)

    # mlp_conv1 + fused global max-pool
    feat, feat_global = pallas_conv1(x_cl, p["conv1_w1"], p["conv1_b1"],
                                     p["conv1_w2"], p["conv1_b2"])       # (B,N,64),(B,64)

    # attention_unit (projections + softmax attention + residual, fully fused)
    attn = pallas_attention_fused(feat, feat_global,
                                  p["attF_w"], p["attF_b"],
                                  p["attG_w"], p["attG_b"],
                                  p["attH_w"], p["attH_b"],
                                  p["att_gamma"])                        # (B, N, 128)

    # mlp_conv2 + fused global max-pool (feat2 never written to HBM)
    feat2 = pallas_conv2_max(attn, p["conv2_w1"], p["conv2_b1"],
                             p["conv2_w2"], p["conv2_b2"])               # (B, 256)

    # final mlp on (B, 256): M == B rows -> plain XLA beats a kernel launch here.
    hidden = jnp.maximum(feat2 @ p["mlp_w1"] + p["mlp_b1"], 0.0)
    out = hidden @ p["mlp_w2"] + p["mlp_b2"]
    return out                                                           # (B, 1)


# ----------------------------------------------------------------------------
# Pure-JAX f32 reference (mirrors the PyTorch module) for a sanity check
# ----------------------------------------------------------------------------
def discriminator_ref(inputs, p):
    x = jnp.transpose(inputs, (0, 2, 1))
    feat = jnp.maximum(x @ p["conv1_w1"] + p["conv1_b1"], 0.0) @ p["conv1_w2"] + p["conv1_b2"]
    fg = jnp.max(feat, axis=1)
    feat_cat = jnp.concatenate(
        [feat, jnp.broadcast_to(fg[:, None, :], feat.shape)], axis=-1)
    f = jnp.maximum(feat_cat @ p["attF_w"] + p["attF_b"], 0.0)
    g = jnp.maximum(feat_cat @ p["attG_w"] + p["attG_b"], 0.0)
    h = jnp.maximum(feat_cat @ p["attH_w"] + p["attH_b"], 0.0)
    s = jnp.einsum("bic,bjc->bij", g, f)
    beta = jax.nn.softmax(s, axis=-1)
    o = jnp.einsum("bij,bic->bjc", beta, h)
    attn = p["att_gamma"] * o + feat_cat
    feat2 = jnp.maximum(attn @ p["conv2_w1"] + p["conv2_b1"], 0.0) @ p["conv2_w2"] + p["conv2_b2"]
    feat2 = jnp.max(feat2, axis=1)
    hidden = jnp.maximum(feat2 @ p["mlp_w1"] + p["mlp_b1"], 0.0)
    return hidden @ p["mlp_w2"] + p["mlp_b2"]


# ----------------------------------------------------------------------------
# Deterministic synthetic parameters (Conv1d/Linear weights in (Cin, Cout) form)
# ----------------------------------------------------------------------------
def init_params(key, in_channels=3):
    S = 32
    keys = iter(jax.random.split(key, 32))

    def w(shape, scale=0.1):
        return jax.random.normal(next(keys), shape, jnp.float32) * scale

    return dict(
        conv1_w1=w((in_channels, S)), conv1_b1=w((S,)),
        conv1_w2=w((S, 2 * S)),       conv1_b2=w((2 * S,)),
        attF_w=w((4 * S, S)),         attF_b=w((S,)),
        attG_w=w((4 * S, S)),         attG_b=w((S,)),
        attH_w=w((4 * S, 4 * S)),     attH_b=w((4 * S,)),
        # PyTorch initializes gamma to 0; use a nonzero value so the attention
        # branch actually contributes in this synthetic run.
        att_gamma=jnp.asarray([0.1], jnp.float32),
        conv2_w1=w((4 * S, 4 * S)),   conv2_b1=w((4 * S,)),
        conv2_w2=w((4 * S, 8 * S)),   conv2_b2=w((8 * S,)),
        mlp_w1=w((8 * S, 8 * S)),     mlp_b1=w((8 * S,)),
        mlp_w2=w((8 * S, 1)),         mlp_b2=w((1,)),
    )


if __name__ == "__main__":
    key = jax.random.PRNGKey(0)
    k_x, k_p = jax.random.split(key)
    B, Cin, N = 2, 3, 16
    inputs = jax.random.normal(k_x, (B, Cin, N), jnp.float32)
    params = init_params(k_p, in_channels=Cin)

    out = jax.jit(discriminator_fwd)(inputs, params)
    out = jax.block_until_ready(out)
    assert out.shape == (B, 1), out.shape
    assert bool(jnp.all(jnp.isfinite(out)))

    # Loose tolerance: kernels use bf16 MXU operands (f32 accumulation) and an
    # approximate EUP reciprocal in the softmax normalization.
    ref = discriminator_ref(inputs, params)
    assert bool(jnp.allclose(out, ref, atol=5e-2, rtol=5e-2)), (out, ref)
    print("KERNEL_OK")
</pallas_src>

<mosaic_0001>
module attributes {stable_mosaic.version = 11 : i64} {
  func.func @conv1_kernel(%arg0: i32, %arg1: i32, %arg2: memref<1x16x8xf32, #tpu.memory_space<vmem>>, %arg3: memref<8x32xf32, #tpu.memory_space<vmem>>, %arg4: memref<1x32xf32, #tpu.memory_space<vmem>>, %arg5: memref<32x64xf32, #tpu.memory_space<vmem>>, %arg6: memref<1x64xf32, #tpu.memory_space<vmem>>, %arg7: memref<1x16x64xf32, #tpu.memory_space<vmem>>, %arg8: memref<1x1x64xf32, #tpu.memory_space<vmem>>) attributes {dimension_semantics = [#tpu.dimension_semantics<parallel>, #tpu.dimension_semantics<arbitrary>], iteration_bounds = array<i64: 2, 1>, scalar_prefetch = 0 : i64, scratch_operands = 0 : i64, tpu.core_type = #tpu.core_type<tc>, window_params = [{transform_indices = @transform_0, window_bounds = array<i64: 1, 16, 8>}, {pipeline_mode = #tpu.pipeline_mode<synchronous>, transform_indices = @transform_1, window_bounds = array<i64: 8, 32>}, {pipeline_mode = #tpu.pipeline_mode<synchronous>, transform_indices = @transform_2, window_bounds = array<i64: 1, 32>}, {pipeline_mode = #tpu.pipeline_mode<synchronous>, transform_indices = @transform_3, window_bounds = array<i64: 32, 64>}, {pipeline_mode = #tpu.pipeline_mode<synchronous>, transform_indices = @transform_4, window_bounds = array<i64: 1, 64>}, {transform_indices = @transform_5, window_bounds = array<i64: 1, 16, 64>}, {transform_indices = @transform_6, window_bounds = array<i64: 1, 1, 64>}]} {
    %c0 = arith.constant 0 : index
    %c0_0 = arith.constant 0 : index
    %c0_1 = arith.constant 0 : index
    %0 = vector.load %arg2[%c0, %c0_0, %c0_1] : memref<1x16x8xf32, #tpu.memory_space<vmem>>, vector<1x16x8xf32>
    %1 = vector.shape_cast %0 : vector<1x16x8xf32> to vector<16x8xf32>
    %2 = arith.truncf %1 : vector<16x8xf32> to vector<16x8xbf16>
    %c0_2 = arith.constant 0 : index
    %c0_3 = arith.constant 0 : index
    %3 = vector.load %arg3[%c0_2, %c0_3] : memref<8x32xf32, #tpu.memory_space<vmem>>, vector<8x32xf32>
    %4 = arith.truncf %3 : vector<8x32xf32> to vector<8x32xbf16>
    %cst = arith.constant dense<0.000000e+00> : vector<16x32xf32>
    %5 = tpu.matmul %2, %4, %cst {dimension_numbers = #tpu.dot_dimension_numbers<[1], [0], [0], [1], [0, 0, 1, 1], [], []>} : vector<16x8xbf16>, vector<8x32xbf16>, vector<16x32xf32> -> vector<16x32xf32>
    %c0_4 = arith.constant 0 : index
    %c0_5 = arith.constant 0 : index
    %6 = vector.load %arg4[%c0_4, %c0_5] : memref<1x32xf32, #tpu.memory_space<vmem>>, vector<1x32xf32>
    %7 = vector.broadcast %6 : vector<1x32xf32> to vector<16x32xf32>
    %8 = arith.addf %5, %7 : vector<16x32xf32>
    %cst_6 = arith.constant 0.000000e+00 : f32
    %9 = vector.broadcast %cst_6 : f32 to vector<16x32xf32>
    %10 = arith.maximumf %8, %9 : vector<16x32xf32>
    %11 = arith.truncf %10 : vector<16x32xf32> to vector<16x32xbf16>
    %c0_7 = arith.constant 0 : index
    %c0_8 = arith.constant 0 : index
    %12 = vector.load %arg5[%c0_7, %c0_8] : memref<32x64xf32, #tpu.memory_space<vmem>>, vector<32x64xf32>
    %13 = arith.truncf %12 : vector<32x64xf32> to vector<32x64xbf16>
    %cst_9 = arith.constant dense<0.000000e+00> : vector<16x64xf32>
    %14 = tpu.matmul %11, %13, %cst_9 {dimension_numbers = #tpu.dot_dimension_numbers<[1], [0], [0], [1], [0, 0, 1, 1], [], []>} : vector<16x32xbf16>, vector<32x64xbf16>, vector<16x64xf32> -> vector<16x64xf32>
    %c0_10 = arith.constant 0 : index
    %c0_11 = arith.constant 0 : index
    %15 = vector.load %arg6[%c0_10, %c0_11] : memref<1x64xf32, #tpu.memory_space<vmem>>, vector<1x64xf32>
    %16 = vector.broadcast %15 : vector<1x64xf32> to vector<16x64xf32>
    %17 = arith.addf %14, %16 : vector<16x64xf32>
    %c0_12 = arith.constant 0 : index
    %c0_13 = arith.constant 0 : index
    %c0_14 = arith.constant 0 : index
    %18 = vector.load %arg7[%c0_12, %c0_13, %c0_14] : memref<1x16x64xf32, #tpu.memory_space<vmem>>, vector<1x16x64xf32>
    %19 = vector.shape_cast %18 : vector<1x16x64xf32> to vector<16x64xf32>
    %20 = vector.shape_cast %17 : vector<16x64xf32> to vector<1x16x64xf32>
    tpu.vector_store %arg7[%c0_12, %c0_13, %c0_14], %20 {strides = array<i32>} : memref<1x16x64xf32, #tpu.memory_space<vmem>>, vector<1x16x64xf32>,
    %c0_i32 = arith.constant 0 : i32
    %21 = arith.cmpi eq, %arg1, %c0_i32 : i32
    %22 = arith.extui %21 : i1 to i32
    %c0_i32_15 = arith.constant 0 : i32
    %23 = arith.cmpi ne, %22, %c0_i32_15 : i32
    scf.if %23 {
      %cst_23 = arith.constant 0xFF800000 : f32
      %32 = vector.broadcast %cst_23 : f32 to vector<1x1x64xf32>
      %c0_24 = arith.constant 0 : index
      %c0_25 = arith.constant 0 : index
      %c0_26 = arith.constant 0 : index
      %33 = vector.load %arg8[%c0_24, %c0_25, %c0_26] : memref<1x1x64xf32, #tpu.memory_space<vmem>>, vector<1x1x64xf32>
      tpu.vector_store %arg8[%c0_24, %c0_25, %c0_26], %32 {strides = array<i32>} : memref<1x1x64xf32, #tpu.memory_space<vmem>>, vector<1x1x64xf32>,
    } else {
    }
    %c0_16 = arith.constant 0 : index
    %c0_17 = arith.constant 0 : index
    %c0_18 = arith.constant 0 : index
    %24 = vector.load %arg8[%c0_16, %c0_17, %c0_18] : memref<1x1x64xf32, #tpu.memory_space<vmem>>, vector<1x1x64xf32>
    %25 = vector.shape_cast %24 : vector<1x1x64xf32> to vector<1x64xf32>
    %cst_19 = arith.constant dense<0xFF800000> : vector<64xf32>
    %26 = vector.multi_reduction <maximumf>, %17, %cst_19 [0] : vector<16x64xf32> to vector<64xf32>
    %27 = vector.shape_cast %26 : vector<64xf32> to vector<1x64xf32>
    %28 = arith.maximumf %25, %27 : vector<1x64xf32>
    %c0_20 = arith.constant 0 : index
    %c0_21 = arith.constant 0 : index
    %c0_22 = arith.constant 0 : index
    %29 = vector.load %arg8[%c0_20, %c0_21, %c0_22] : memref<1x1x64xf32, #tpu.memory_space<vmem>>, vector<1x1x64xf32>
    %30 = vector.shape_cast %29 : vector<1x1x64xf32> to vector<1x64xf32>
    %31 = vector.shape_cast %28 : vector<1x64xf32> to vector<1x1x64xf32>
    tpu.vector_store %arg8[%c0_20, %c0_21, %c0_22], %31 {strides = array<i32>} : memref<1x1x64xf32, #tpu.memory_space<vmem>>, vector<1x1x64xf32>,
    return
  }
  func.func @transform_0(%arg0: i32, %arg1: i32) -> (i32, i32, i32) {
    %c0_i32 = arith.constant 0 : i32
    %c0_i32_0 = arith.constant 0 : i32
    return %arg0, %arg1, %c0_i32 : i32, i32, i32
  }
  func.func @transform_1(%arg0: i32, %arg1: i32) -> (i32, i32) {
    %c0_i32 = arith.constant 0 : i32
    %c0_i32_0 = arith.constant 0 : i32
    %c0_i32_1 = arith.constant 0 : i32
    return %c0_i32, %c0_i32_0 : i32, i32
  }
  func.func @transform_2(%arg0: i32, %arg1: i32) -> (i32, i32) {
    %c0_i32 = arith.constant 0 : i32
    %c0_i32_0 = arith.constant 0 : i32
    %c0_i32_1 = arith.constant 0 : i32
    return %c0_i32, %c0_i32_0 : i32, i32
  }
  func.func @transform_3(%arg0: i32, %arg1: i32) -> (i32, i32) {
    %c0_i32 = arith.constant 0 : i32
    %c0_i32_0 = arith.constant 0 : i32
    %c0_i32_1 = arith.constant 0 : i32
    return %c0_i32, %c0_i32_0 : i32, i32
  }
  func.func @transform_4(%arg0: i32, %arg1: i32) -> (i32, i32) {
    %c0_i32 = arith.constant 0 : i32
    %c0_i32_0 = arith.constant 0 : i32
    %c0_i32_1 = arith.constant 0 : i32
    return %c0_i32, %c0_i32_0 : i32, i32
  }
  func.func @transform_5(%arg0: i32, %arg1: i32) -> (i32, i32, i32) {
    %c0_i32 = arith.constant 0 : i32
    %c0_i32_0 = arith.constant 0 : i32
    return %arg0, %arg1, %c0_i32 : i32, i32, i32
  }
  func.func @transform_6(%arg0: i32, %arg1: i32) -> (i32, i32, i32) {
    %c0_i32 = arith.constant 0 : i32
    %c0_i32_0 = arith.constant 0 : i32
    %c0_i32_1 = arith.constant 0 : i32
    return %arg0, %c0_i32, %c0_i32_0 : i32, i32, i32
  }
}

module attributes {stable_mosaic.version = 11 : i64} {
  func.func @conv2max_kernel(%arg0: i32, %arg1: i32, %arg2: memref<1x16x128xf32, #tpu.memory_space<vmem>>, %arg3: memref<128x128xf32, #tpu.memory_space<vmem>>, %arg4: memref<1x128xf32, #tpu.memory_space<vmem>>, %arg5: memref<128x256xf32, #tpu.memory_space<vmem>>, %arg6: memref<1x256xf32, #tpu.memory_space<vmem>>, %arg7: memref<1x1x256xf32, #tpu.memory_space<vmem>>) attributes {dimension_semantics = [#tpu.dimension_semantics<parallel>, #tpu.dimension_semantics<arbitrary>], iteration_bounds = array<i64: 2, 1>, scalar_prefetch = 0 : i64, scratch_operands = 0 : i64, tpu.core_type = #tpu.core_type<tc>, window_params = [{transform_indices = @transform_0, window_bounds = array<i64: 1, 16, 128>}, {pipeline_mode = #tpu.pipeline_mode<synchronous>, transform_indices = @transform_1, window_bounds = array<i64: 128, 128>}, {pipeline_mode = #tpu.pipeline_mode<synchronous>, transform_indices = @transform_2, window_bounds = array<i64: 1, 128>}, {pipeline_mode = #tpu.pipeline_mode<synchronous>, transform_indices = @transform_3, window_bounds = array<i64: 128, 256>}, {pipeline_mode = #tpu.pipeline_mode<synchronous>, transform_indices = @transform_4, window_bounds = array<i64: 1, 256>}, {transform_indices = @transform_5, window_bounds = array<i64: 1, 1, 256>}]} {
    %c0 = arith.constant 0 : index
    %c0_0 = arith.constant 0 : index
    %c0_1 = arith.constant 0 : index
    %0 = vector.load %arg2[%c0, %c0_0, %c0_1] : memref<1x16x128xf32, #tpu.memory_space<vmem>>, vector<1x16x128xf32>
    %1 = vector.shape_cast %0 : vector<1x16x128xf32> to vector<16x128xf32>
    %2 = arith.truncf %1 : vector<16x128xf32> to vector<16x128xbf16>
    %c0_2 = arith.constant 0 : index
    %c0_3 = arith.constant 0 : index
    %3 = vector.load %arg3[%c0_2, %c0_3] : memref<128x128xf32, #tpu.memory_space<vmem>>, vector<128x128xf32>
    %4 = arith.truncf %3 : vector<128x128xf32> to vector<128x128xbf16>
    %cst = arith.constant dense<0.000000e+00> : vector<16x128xf32>
    %5 = tpu.matmul %2, %4, %cst {dimension_numbers = #tpu.dot_dimension_numbers<[1], [0], [0], [1], [0, 0, 1, 1], [], []>} : vector<16x128xbf16>, vector<128x128xbf16>, vector<16x128xf32> -> vector<16x128xf32>
    %c0_4 = arith.constant 0 : index
    %c0_5 = arith.constant 0 : index
    %6 = vector.load %arg4[%c0_4, %c0_5] : memref<1x128xf32, #tpu.memory_space<vmem>>, vector<1x128xf32>
    %7 = vector.broadcast %6 : vector<1x128xf32> to vector<16x128xf32>
    %8 = arith.addf %5, %7 : vector<16x128xf32>
    %cst_6 = arith.constant 0.000000e+00 : f32
    %9 = vector.broadcast %cst_6 : f32 to vector<16x128xf32>
    %10 = arith.maximumf %8, %9 : vector<16x128xf32>
    %11 = arith.truncf %10 : vector<16x128xf32> to vector<16x128xbf16>
    %c0_7 = arith.constant 0 : index
    %c0_8 = arith.constant 0 : index
    %12 = vector.load %arg5[%c0_7, %c0_8] : memref<128x256xf32, #tpu.memory_space<vmem>>, vector<128x256xf32>
    %13 = arith.truncf %12 : vector<128x256xf32> to vector<128x256xbf16>
    %cst_9 = arith.constant dense<0.000000e+00> : vector<16x256xf32>
    %14 = tpu.matmul %11, %13, %cst_9 {dimension_numbers = #tpu.dot_dimension_numbers<[1], [0], [0], [1], [0, 0, 1, 1], [], []>} : vector<16x128xbf16>, vector<128x256xbf16>, vector<16x256xf32> -> vector<16x256xf32>
    %c0_10 = arith.constant 0 : index
    %c0_11 = arith.constant 0 : index
    %15 = vector.load %arg6[%c0_10, %c0_11] : memref<1x256xf32, #tpu.memory_space<vmem>>, vector<1x256xf32>
    %16 = vector.broadcast %15 : vector<1x256xf32> to vector<16x256xf32>
    %17 = arith.addf %14, %16 : vector<16x256xf32>
    %c0_i32 = arith.constant 0 : i32
    %18 = arith.cmpi eq, %arg1, %c0_i32 : i32
    %19 = arith.extui %18 : i1 to i32
    %c0_i32_12 = arith.constant 0 : i32
    %20 = arith.cmpi ne, %19, %c0_i32_12 : i32
    scf.if %20 {
      %cst_20 = arith.constant 0xFF800000 : f32
      %29 = vector.broadcast %cst_20 : f32 to vector<1x1x256xf32>
      %c0_21 = arith.constant 0 : index
      %c0_22 = arith.constant 0 : index
      %c0_23 = arith.constant 0 : index
      %30 = vector.load %arg7[%c0_21, %c0_22, %c0_23] : memref<1x1x256xf32, #tpu.memory_space<vmem>>, vector<1x1x256xf32>
      tpu.vector_store %arg7[%c0_21, %c0_22, %c0_23], %29 {strides = array<i32>} : memref<1x1x256xf32, #tpu.memory_space<vmem>>, vector<1x1x256xf32>,
    } else {
    }
    %c0_13 = arith.constant 0 : index
    %c0_14 = arith.constant 0 : index
    %c0_15 = arith.constant 0 : index
    %21 = vector.load %arg7[%c0_13, %c0_14, %c0_15] : memref<1x1x256xf32, #tpu.memory_space<vmem>>, vector<1x1x256xf32>
    %22 = vector.shape_cast %21 : vector<1x1x256xf32> to vector<1x256xf32>
    %cst_16 = arith.constant dense<0xFF800000> : vector<256xf32>
    %23 = vector.multi_reduction <maximumf>, %17, %cst_16 [0] : vector<16x256xf32> to vector<256xf32>
    %24 = vector.shape_cast %23 : vector<256xf32> to vector<1x256xf32>
    %25 = arith.maximumf %22, %24 : vector<1x256xf32>
    %c0_17 = arith.constant 0 : index
    %c0_18 = arith.constant 0 : index
    %c0_19 = arith.constant 0 : index
    %26 = vector.load %arg7[%c0_17, %c0_18, %c0_19] : memref<1x1x256xf32, #tpu.memory_space<vmem>>, vector<1x1x256xf32>
    %27 = vector.shape_cast %26 : vector<1x1x256xf32> to vector<1x256xf32>
    %28 = vector.shape_cast %25 : vector<1x256xf32> to vector<1x1x256xf32>
    tpu.vector_store %arg7[%c0_17, %c0_18, %c0_19], %28 {strides = array<i32>} : memref<1x1x256xf32, #tpu.memory_space<vmem>>, vector<1x1x256xf32>,
    return
  }
  func.func @transform_0(%arg0: i32, %arg1: i32) -> (i32, i32, i32) {
    %c0_i32 = arith.constant 0 : i32
    %c0_i32_0 = arith.constant 0 : i32
    return %arg0, %arg1, %c0_i32 : i32, i32, i32
  }
  func.func @transform_1(%arg0: i32, %arg1: i32) -> (i32, i32) {
    %c0_i32 = arith.constant 0 : i32
    %c0_i32_0 = arith.constant 0 : i32
    %c0_i32_1 = arith.constant 0 : i32
    return %c0_i32, %c0_i32_0 : i32, i32
  }
  func.func @transform_2(%arg0: i32, %arg1: i32) -> (i32, i32) {
    %c0_i32 = arith.constant 0 : i32
    %c0_i32_0 = arith.constant 0 : i32
    %c0_i32_1 = arith.constant 0 : i32
    return %c0_i32, %c0_i32_0 : i32, i32
  }
  func.func @transform_3(%arg0: i32, %arg1: i32) -> (i32, i32) {
    %c0_i32 = arith.constant 0 : i32
    %c0_i32_0 = arith.constant 0 : i32
    %c0_i32_1 = arith.constant 0 : i32
    return %c0_i32, %c0_i32_0 : i32, i32
  }
  func.func @transform_4(%arg0: i32, %arg1: i32) -> (i32, i32) {
    %c0_i32 = arith.constant 0 : i32
    %c0_i32_0 = arith.constant 0 : i32
    %c0_i32_1 = arith.constant 0 : i32
    return %c0_i32, %c0_i32_0 : i32, i32
  }
  func.func @transform_5(%arg0: i32, %arg1: i32) -> (i32, i32, i32) {
    %c0_i32 = arith.constant 0 : i32
    %c0_i32_0 = arith.constant 0 : i32
    %c0_i32_1 = arith.constant 0 : i32
    return %arg0, %c0_i32, %c0_i32_0 : i32, i32, i32
  }
}

module attributes {stable_mosaic.version = 11 : i64} {
  func.func @attn_fused_kernel(%arg0: i32, %arg1: i32, %arg2: memref<1x16x64xf32, #tpu.memory_space<vmem>>, %arg3: memref<1x1x64xf32, #tpu.memory_space<vmem>>, %arg4: memref<64x32xf32, #tpu.memory_space<vmem>>, %arg5: memref<1x1x32xf32, #tpu.memory_space<vmem>>, %arg6: memref<64x32xf32, #tpu.memory_space<vmem>>, %arg7: memref<1x1x32xf32, #tpu.memory_space<vmem>>, %arg8: memref<64x128xf32, #tpu.memory_space<vmem>>, %arg9: memref<1x1x128xf32, #tpu.memory_space<vmem>>, %arg10: memref<1x1xf32, #tpu.memory_space<smem>>, %arg11: memref<1x16x128xf32, #tpu.memory_space<vmem>>, %arg12: memref<16x32xf32, #tpu.memory_space<vmem>>) attributes {dimension_semantics = [#tpu.dimension_semantics<parallel>, #tpu.dimension_semantics<arbitrary>], iteration_bounds = array<i64: 2, 1>, scalar_prefetch = 0 : i64, scratch_operands = 1 : i64, tpu.core_type = #tpu.core_type<tc>, window_params = [{transform_indices = @transform_0, window_bounds = array<i64: 1, 16, 64>}, {transform_indices = @transform_1, window_bounds = array<i64: 1, 1, 64>}, {pipeline_mode = #tpu.pipeline_mode<synchronous>, transform_indices = @transform_2, window_bounds = array<i64: 64, 32>}, {transform_indices = @transform_3, window_bounds = array<i64: 1, 1, 32>}, {pipeline_mode = #tpu.pipeline_mode<synchronous>, transform_indices = @transform_4, window_bounds = array<i64: 64, 32>}, {transform_indices = @transform_5, window_bounds = array<i64: 1, 1, 32>}, {pipeline_mode = #tpu.pipeline_mode<synchronous>, transform_indices = @transform_6, window_bounds = array<i64: 64, 128>}, {transform_indices = @transform_7, window_bounds = array<i64: 1, 1, 128>}, {transform_indices = @transform_8, window_bounds = array<i64: 1, 1>}, {transform_indices = @transform_9, window_bounds = array<i64: 1, 16, 128>}]} {
    %c0_i32 = arith.constant 0 : i32
    %0 = arith.cmpi eq, %arg1, %c0_i32 : i32
    %1 = arith.extui %0 : i1 to i32
    %c0_i32_0 = arith.constant 0 : i32
    %2 = arith.cmpi ne, %1, %c0_i32_0 : i32
    scf.if %2 {
      %c0_29 = arith.constant 0 : index
      %c0_30 = arith.constant 0 : index
      %c0_31 = arith.constant 0 : index
      %53 = vector.load %arg2[%c0_29, %c0_30, %c0_31] : memref<1x16x64xf32, #tpu.memory_space<vmem>>, vector<1x16x64xf32>
      %54 = vector.shape_cast %53 : vector<1x16x64xf32> to vector<16x64xf32>
      %55 = arith.truncf %54 : vector<16x64xf32> to vector<16x64xbf16>
      %c0_32 = arith.constant 0 : index
      %c0_33 = arith.constant 0 : index
      %56 = vector.load %arg4[%c0_32, %c0_33] : memref<64x32xf32, #tpu.memory_space<vmem>>, vector<64x32xf32>
      %57 = arith.truncf %56 : vector<64x32xf32> to vector<64x32xbf16>
      %cst_34 = arith.constant dense<0.000000e+00> : vector<16x32xf32>
      %58 = tpu.matmul %55, %57, %cst_34 {dimension_numbers = #tpu.dot_dimension_numbers<[1], [0], [0], [1], [0, 0, 1, 1], [], []>} : vector<16x64xbf16>, vector<64x32xbf16>, vector<16x32xf32> -> vector<16x32xf32>
      %c0_35 = arith.constant 0 : index
      %c0_36 = arith.constant 0 : index
      %c0_37 = arith.constant 0 : index
      %59 = vector.load %arg5[%c0_35, %c0_36, %c0_37] : memref<1x1x32xf32, #tpu.memory_space<vmem>>, vector<1x1x32xf32>
      %60 = vector.shape_cast %59 : vector<1x1x32xf32> to vector<1x32xf32>
      %61 = vector.broadcast %60 : vector<1x32xf32> to vector<16x32xf32>
      %62 = arith.addf %58, %61 : vector<16x32xf32>
      %cst_38 = arith.constant 0.000000e+00 : f32
      %63 = vector.broadcast %cst_38 : f32 to vector<16x32xf32>
      %64 = arith.maximumf %62, %63 : vector<16x32xf32>
      %c0_39 = arith.constant 0 : index
      %c0_40 = arith.constant 0 : index
      %65 = vector.load %arg12[%c0_39, %c0_40] : memref<16x32xf32, #tpu.memory_space<vmem>>, vector<16x32xf32>
      tpu.vector_store %arg12[%c0_39, %c0_40], %64 {strides = array<i32>} : memref<16x32xf32, #tpu.memory_space<vmem>>, vector<16x32xf32>,
      %cst_41 = arith.constant 0.000000e+00 : f32
      %66 = vector.broadcast %cst_41 : f32 to vector<1x16x128xf32>
      %c0_42 = arith.constant 0 : index
      %c0_43 = arith.constant 0 : index
      %c0_44 = arith.constant 0 : index
      %67 = vector.load %arg11[%c0_42, %c0_43, %c0_44] : memref<1x16x128xf32, #tpu.memory_space<vmem>>, vector<1x16x128xf32>
      tpu.vector_store %arg11[%c0_42, %c0_43, %c0_44], %66 {strides = array<i32>} : memref<1x16x128xf32, #tpu.memory_space<vmem>>, vector<1x16x128xf32>,
    } else {
    }
    %c16_i32 = arith.constant 16 : i32
    %3 = arith.muli %arg1, %c16_i32 : i32
    %4 = tpu.assume_multiple %3, 8 : i32
    %c0 = arith.constant 0 : index
    %5 = arith.index_cast %4 : i32 to index
    %c0_1 = arith.constant 0 : index
    %6 = vector.load %arg2[%c0, %5, %c0_1] : memref<1x16x64xf32, #tpu.memory_space<vmem>>, vector<1x16x64xf32>
    %7 = vector.shape_cast %6 : vector<1x16x64xf32> to vector<16x64xf32>
    %8 = arith.truncf %7 : vector<16x64xf32> to vector<16x64xbf16>
    %c0_2 = arith.constant 0 : index
    %c0_3 = arith.constant 0 : index
    %9 = vector.load %arg6[%c0_2, %c0_3] : memref<64x32xf32, #tpu.memory_space<vmem>>, vector<64x32xf32>
    %10 = arith.truncf %9 : vector<64x32xf32> to vector<64x32xbf16>
    %cst = arith.constant dense<0.000000e+00> : vector<16x32xf32>
    %11 = tpu.matmul %8, %10, %cst {dimension_numbers = #tpu.dot_dimension_numbers<[1], [0], [0], [1], [0, 0, 1, 1], [], []>} : vector<16x64xbf16>, vector<64x32xbf16>, vector<16x32xf32> -> vector<16x32xf32>
    %c0_4 = arith.constant 0 : index
    %c0_5 = arith.constant 0 : index
    %c0_6 = arith.constant 0 : index
    %12 = vector.load %arg7[%c0_4, %c0_5, %c0_6] : memref<1x1x32xf32, #tpu.memory_space<vmem>>, vector<1x1x32xf32>
    %13 = vector.shape_cast %12 : vector<1x1x32xf32> to vector<1x32xf32>
    %14 = vector.broadcast %13 : vector<1x32xf32> to vector<16x32xf32>
    %15 = arith.addf %11, %14 : vector<16x32xf32>
    %cst_7 = arith.constant 0.000000e+00 : f32
    %16 = vector.broadcast %cst_7 : f32 to vector<16x32xf32>
    %17 = arith.maximumf %15, %16 : vector<16x32xf32>
    %c0_8 = arith.constant 0 : index
    %c0_9 = arith.constant 0 : index
    %18 = vector.load %arg8[%c0_8, %c0_9] : memref<64x128xf32, #tpu.memory_space<vmem>>, vector<64x128xf32>
    %19 = arith.truncf %18 : vector<64x128xf32> to vector<64x128xbf16>
    %cst_10 = arith.constant dense<0.000000e+00> : vector<16x128xf32>
    %20 = tpu.matmul %8, %19, %cst_10 {dimension_numbers = #tpu.dot_dimension_numbers<[1], [0], [0], [1], [0, 0, 1, 1], [], []>} : vector<16x64xbf16>, vector<64x128xbf16>, vector<16x128xf32> -> vector<16x128xf32>
    %c0_11 = arith.constant 0 : index
    %c0_12 = arith.constant 0 : index
    %c0_13 = arith.constant 0 : index
    %21 = vector.load %arg9[%c0_11, %c0_12, %c0_13] : memref<1x1x128xf32, #tpu.memory_space<vmem>>, vector<1x1x128xf32>
    %22 = vector.shape_cast %21 : vector<1x1x128xf32> to vector<1x128xf32>
    %23 = vector.broadcast %22 : vector<1x128xf32> to vector<16x128xf32>
    %24 = arith.addf %20, %23 : vector<16x128xf32>
    %cst_14 = arith.constant 0.000000e+00 : f32
    %25 = vector.broadcast %cst_14 : f32 to vector<16x128xf32>
    %26 = arith.maximumf %24, %25 : vector<16x128xf32>
    %27 = arith.truncf %17 : vector<16x32xf32> to vector<16x32xbf16>
    %c0_15 = arith.constant 0 : index
    %c0_16 = arith.constant 0 : index
    %28 = vector.load %arg12[%c0_15, %c0_16] : memref<16x32xf32, #tpu.memory_space<vmem>>, vector<16x32xf32>
    %29 = arith.truncf %28 : vector<16x32xf32> to vector<16x32xbf16>
    %cst_17 = arith.constant dense<0.000000e+00> : vector<16x16xf32>
    %30 = tpu.matmul %27, %29, %cst_17 {dimension_numbers = #tpu.dot_dimension_numbers<[1], [1], [0], [0], [0, 0, 1, 0], [], []>} : vector<16x32xbf16>, vector<16x32xbf16>, vector<16x16xf32> -> vector<16x16xf32>
    %cst_18 = arith.constant dense<0xFF800000> : vector<16xf32>
    %31 = vector.multi_reduction <maximumf>, %30, %cst_18 [1] : vector<16x16xf32> to vector<16xf32>
    %32 = vector.shape_cast %31 : vector<16xf32> to vector<16x1xf32>
    %33 = vector.broadcast %32 : vector<16x1xf32> to vector<16x16xf32>
    %34 = arith.subf %30, %33 : vector<16x16xf32>
    %35 = math.exp %34 : vector<16x16xf32>
    %cst_19 = arith.constant dense<0.000000e+00> : vector<16xf32>
    %36 = vector.multi_reduction <add>, %35, %cst_19 [1] : vector<16x16xf32> to vector<16xf32>
    %37 = vector.shape_cast %36 : vector<16xf32> to vector<16x1xf32>
    %38 = tpu.reciprocal %37 {approx = true} : vector<16x1xf32> -> vector<16x1xf32>
    %39 = vector.broadcast %38 : vector<16x1xf32> to vector<16x128xf32>
    %40 = arith.mulf %26, %39 : vector<16x128xf32>
    %c0_20 = arith.constant 0 : index
    %c0_21 = arith.constant 0 : index
    %c0_22 = arith.constant 0 : index
    %41 = vector.load %arg11[%c0_20, %c0_21, %c0_22] : memref<1x16x128xf32, #tpu.memory_space<vmem>>, vector<1x16x128xf32>
    %42 = vector.shape_cast %41 : vector<1x16x128xf32> to vector<16x128xf32>
    %43 = arith.truncf %35 : vector<16x16xf32> to vector<16x16xbf16>
    %44 = arith.truncf %40 : vector<16x128xf32> to vector<16x128xbf16>
    %cst_23 = arith.constant dense<0.000000e+00> : vector<16x128xf32>
    %45 = tpu.matmul %43, %44, %cst_23 {dimension_numbers = #tpu.dot_dimension_numbers<[0], [0], [1], [1], [0, 1, 1, 1], [], []>} : vector<16x16xbf16>, vector<16x128xbf16>, vector<16x128xf32> -> vector<16x128xf32>
    %46 = arith.addf %42, %45 : vector<16x128xf32>
    %c0_24 = arith.constant 0 : index
    %c0_25 = arith.constant 0 : index
    %c0_26 = arith.constant 0 : index
    %47 = vector.load %arg11[%c0_24, %c0_25, %c0_26] : memref<1x16x128xf32, #tpu.memory_space<vmem>>, vector<1x16x128xf32>
    %48 = vector.shape_cast %47 : vector<1x16x128xf32> to vector<16x128xf32>
    %49 = vector.shape_cast %46 : vector<16x128xf32> to vector<1x16x128xf32>
    tpu.vector_store %arg11[%c0_24, %c0_25, %c0_26], %49 {strides = array<i32>} : memref<1x16x128xf32, #tpu.memory_space<vmem>>, vector<1x16x128xf32>,
    %c0_i32_27 = arith.constant 0 : i32
    %50 = arith.cmpi eq, %arg1, %c0_i32_27 : i32
    %51 = arith.extui %50 : i1 to i32
    %c0_i32_28 = arith.constant 0 : i32
    %52 = arith.cmpi ne, %51, %c0_i32_28 : i32
    scf.if %52 {
      %c0_29 = arith.constant 0 : index
      %c0_30 = arith.constant 0 : index
      %c0_31 = arith.constant 0 : index
      %53 = vector.load %arg2[%c0_29, %c0_30, %c0_31] : memref<1x16x64xf32, #tpu.memory_space<vmem>>, vector<1x16x64xf32>
      %54 = vector.shape_cast %53 : vector<1x16x64xf32> to vector<16x64xf32>
      %c0_32 = arith.constant 0 : index
      %c0_33 = arith.constant 0 : index
      %c0_34 = arith.constant 0 : index
      %55 = vector.load %arg3[%c0_32, %c0_33, %c0_34] : memref<1x1x64xf32, #tpu.memory_space<vmem>>, vector<1x1x64xf32>
      %56 = vector.shape_cast %55 : vector<1x1x64xf32> to vector<1x64xf32>
      %57 = vector.shape_cast %56 : vector<1x64xf32> to vector<1x64xf32>
      %58 = vector.broadcast %57 : vector<1x64xf32> to vector<16x64xf32>
      %59 = tpu.concatenate %54, %58 in 1 : vector<16x64xf32>, vector<16x64xf32> -> vector<16x128xf32>
      %c0_35 = arith.constant 0 : index
      %c0_36 = arith.constant 0 : index
      %60 = memref.load %arg10[%c0_35, %c0_36] : memref<1x1xf32, #tpu.memory_space<smem>>
      %c0_37 = arith.constant 0 : index
      %c0_38 = arith.constant 0 : index
      %c0_39 = arith.constant 0 : index
      %61 = vector.load %arg11[%c0_37, %c0_38, %c0_39] : memref<1x16x128xf32, #tpu.memory_space<vmem>>, vector<1x16x128xf32>
      %62 = vector.shape_cast %61 : vector<1x16x128xf32> to vector<16x128xf32>
      %63 = vector.broadcast %60 : f32 to vector<16x128xf32>
      %64 = arith.mulf %63, %62 : vector<16x128xf32>
      %65 = arith.addf %64, %59 : vector<16x128xf32>
      %c0_40 = arith.constant 0 : index
      %c0_41 = arith.constant 0 : index
      %c0_42 = arith.constant 0 : index
      %66 = vector.load %arg11[%c0_40, %c0_41, %c0_42] : memref<1x16x128xf32, #tpu.memory_space<vmem>>, vector<1x16x128xf32>
      %67 = vector.shape_cast %66 : vector<1x16x128xf32> to vector<16x128xf32>
      %68 = vector.shape_cast %65 : vector<16x128xf32> to vector<1x16x128xf32>
      tpu.vector_store %arg11[%c0_40, %c0_41, %c0_42], %68 {strides = array<i32>} : memref<1x16x128xf32, #tpu.memory_space<vmem>>, vector<1x16x128xf32>,
    } else {
    }
    return
  }
  func.func @transform_0(%arg0: i32, %arg1: i32) -> (i32, i32, i32) {
    %c0_i32 = arith.constant 0 : i32
    %c0_i32_0 = arith.constant 0 : i32
    %c0_i32_1 = arith.constant 0 : i32
    return %arg0, %c0_i32, %c0_i32_0 : i32, i32, i32
  }
  func.func @transform_1(%arg0: i32, %arg1: i32) -> (i32, i32, i32) {
    %c0_i32 = arith.constant 0 : i32
    %c0_i32_0 = arith.constant 0 : i32
    %c0_i32_1 = arith.constant 0 : i32
    return %arg0, %c0_i32, %c0_i32_0 : i32, i32, i32
  }
  func.func @transform_2(%arg0: i32, %arg1: i32) -> (i32, i32) {
    %c0_i32 = arith.constant 0 : i32
    %c0_i32_0 = arith.constant 0 : i32
    %c0_i32_1 = arith.constant 0 : i32
    return %c0_i32, %c0_i32_0 : i32, i32
  }
  func.func @transform_3(%arg0: i32, %arg1: i32) -> (i32, i32, i32) {
    %c0_i32 = arith.constant 0 : i32
    %c0_i32_0 = arith.constant 0 : i32
    %c0_i32_1 = arith.constant 0 : i32
    return %arg0, %c0_i32, %c0_i32_0 : i32, i32, i32
  }
  func.func @transform_4(%arg0: i32, %arg1: i32) -> (i32, i32) {
    %c0_i32 = arith.constant 0 : i32
    %c0_i32_0 = arith.constant 0 : i32
    %c0_i32_1 = arith.constant 0 : i32
    return %c0_i32, %c0_i32_0 : i32, i32
  }
  func.func @transform_5(%arg0: i32, %arg1: i32) -> (i32, i32, i32) {
    %c0_i32 = arith.constant 0 : i32
    %c0_i32_0 = arith.constant 0 : i32
    %c0_i32_1 = arith.constant 0 : i32
    return %arg0, %c0_i32, %c0_i32_0 : i32, i32, i32
  }
  func.func @transform_6(%arg0: i32, %arg1: i32) -> (i32, i32) {
    %c0_i32 = arith.constant 0 : i32
    %c0_i32_0 = arith.constant 0 : i32
    %c0_i32_1 = arith.constant 0 : i32
    return %c0_i32, %c0_i32_0 : i32, i32
  }
  func.func @transform_7(%arg0: i32, %arg1: i32) -> (i32, i32, i32) {
    %c0_i32 = arith.constant 0 : i32
    %c0_i32_0 = arith.constant 0 : i32
    %c0_i32_1 = arith.constant 0 : i32
    return %arg0, %c0_i32, %c0_i32_0 : i32, i32, i32
  }
  func.func @transform_8(%arg0: i32, %arg1: i32) -> (i32, i32) {
    %c0_i32 = arith.constant 0 : i32
    %c0_i32_0 = arith.constant 0 : i32
    %c0_i32_1 = arith.constant 0 : i32
    return %c0_i32, %c0_i32_0 : i32, i32
  }
  func.func @transform_9(%arg0: i32, %arg1: i32) -> (i32, i32, i32) {
    %c0_i32 = arith.constant 0 : i32
    %c0_i32_0 = arith.constant 0 : i32
    %c0_i32_1 = arith.constant 0 : i32
    return %arg0, %c0_i32, %c0_i32_0 : i32, i32, i32
  }
}

</mosaic_0001>

<bundles_post_ra>
// kernel: discriminator_fwd.3
= control target key start
LH: loop header
LB: loop body
LE: loop exit
PB: predicated region body
PF: predicated region fallthrough
CT: control target
= control target key end

     0   :  { %s682_s21 = smov 0   ;;  %s684_s22 = smov 0   ;;  %s754_s0 = inlined_call_operand.vmem [shape: f32[2,16,8], index: 0, kind: input, shape index: {}]   ;;  %s755_s1 = inlined_call_operand.vmem [shape: f32[8,32], index: 1, kind: input, shape index: {}]   ;;  %s756_s2 = inlined_call_operand.vmem [shape: f32[1,32], index: 2, kind: input, shape index: {}]   ;;  %s757_s3 = inlined_call_operand.vmem [shape: f32[32,64], index: 3, kind: input, shape index: {}]   ;;  %s758_s4 = inlined_call_operand.vmem [shape: f32[1,64], index: 4, kind: input, shape index: {}]   ;;  %s759_s5 = inlined_call_operand.vmem [shape: f32[2,16,64], index: 5, kind: output, shape index: {0}]   ;;  %s760_s6 = inlined_call_operand.vmem [shape: f32[2,1,64], index: 6, kind: output, shape index: {1}]  }
   0x1   :  { %s686_s23 = smov 0  }
   0x2 LB: > { %s29_s24 = sadd.s32 1, %s638_s22  ;;  %p561_p0 = scmp.ge.s32.totalorder %s642_s23, 1  ;;  %s642_s23 = sphi %s686_s23, %s17_s23   ;;  %s638_s22 = sphi %s684_s22, %s762_s22   ;;  %s634_s21 = sphi %s682_s21, %s761_s21  }
   0x3   : > { %p31_p1 = scmp.ge.s32.totalorder %s29_s24, 2  ;;  %p236_p2 = scmp.lt.s32.totalorder %s642_s23, 3 }
   0x5   : > { %s764_s24 = smov (%p31_p1, %s29_s24), 0  ;;  %p237_p3 = pnand %p561_p0, %p236_p2 }
   0x6   : > { %p278_p4 = scmp.lt.s32.totalorder (!%p237_p3), %s634_s21, 1 }
   0x7   : > { %240 = sbr.rel (%p237_p3) target bundleno = 439 (0x1b7), region = 40 }
   0xc   : > { %v304_v0 = vld [vmem:[%s755_s1] sm:$0xff]  ;;  %vm317_vm0 = vcmask 1043456   ;;  %v644_v1 = vmov 0.0   ;;  %vm645_vm1 = vmmov 0   ;;  %s766_s21 = smov (!%p278_p4, %s634_s21), 1  ;;  %vm430_vm2 = vcmask 516096  }
   0xd   : > { %579 = vmatprep.subr.bf16.mxu0 %v644_v1  ;;  %v305_v2 = vpack.c.bf16 %v304_v0, %v304_v0  ;;  %581 = vmatprep.mubr.msk.bf16.mxu0 %vm645_vm1, %v644_v1  ;;  %s572_s27 = sshll.u32 %s766_s21, 4  ;;  %s710_s30 = scalar_lea.vmem %s760_s6, %s766_s21  ;;  %v646_v4 = vmov -inf   ;;  %vm313_vm3 = vcmask 64512   ;;  %v367_v8 = vld [vmem:[%s757_s3 + $0x10] sm:$0xff]  ;;  %v368_v9 = vld [vmem:[%s757_s3 + $0x18] sm:$0xff]  ;;  %v365_v11 = vld [vmem:[%s757_s3] sm:$0xff] }
   0xe   : > { %585 = vmatprep.subr.bf16.mxu1 %v644_v1  ;;  %589 = vmatprep.mubr.msk.bf16.mxu1 %vm645_vm1, %v644_v1  ;;  %s285_s9 = scalar_lea.vmem %s754_s0, %s572_s27  ;;  %431 = vst.msk [vmem:[%s710_s30] sm:$0x1] %vm430_vm2, %v646_v4  ;;  %v370_v10 = vpack.c.bf16 %v368_v9, %v367_v8  ;;  %v366_v12 = vld [vmem:[%s757_s3 + $0x8] sm:$0xff]  ;;  %v566_v14 = vld [vmem:[%s756_s2] ss:$0 sm:$0xff]  ;;  %vm378_vm4 = vcmask 261120   ;;  %s295_s29 = scalar_lea.vmem %s759_s5, %s572_s27 }
   0xf   : > { %v319_v3 = vsel %vm317_vm0, %v305_v2, 0  ;;  %v301_v5 = vld [vmem:[%s285_s9] sm:$0xff]  ;;  %v302_v6 = vld [vmem:[%s285_s9 + $0x8] sm:$0xff]  ;;  %v369_v13 = vpack.c.bf16 %v366_v12, %v365_v11  ;;  %vm423_vm5 = vcmask 523264  }
  0x10   : > { %580 = vmatpush3.bf16.msra.mxu0 %v319_v3  ;;  %v303_v7 = vpack.c.bf16 %v302_v6, %v301_v5  ;;  %586 = vmatpush3.bf16.msra.mxu1 %v370_v10  ;;  %v568_v24 = vld [vmem:[%s758_s4] ss:$0 sm:$0xff] }
  0x11   : > { %587 = vmatprep.subr.bf16.mxu1 %v644_v1 }
  0x13   : > { %582 = vmatmul.mubr.msk.bf16.vlgmr.msra.gmra.mxu0 %vm313_vm3, %v303_v7 }
  0x14   : > { %588 = vmatpush3.bf16.msra.mxu1 %v369_v13 }
  0x15   : > { %v432_v39 = vld [vmem:[%s710_s30] sm:$0x1] }
  0xd3   : > { %v355_v15 = vpop.f32.mrf.mxu0 }
  0xd4   : > { %v356_v17 = vadd.f32 %v566_v14, %v355_v15 }
  0xd5   : > { %v583_v16 = vpop.f32.mrf.mxu0 }
  0xd6   : > { %v362_v21 = vmax.f32 %v356_v17, 0.0 }
  0xd7   : > { %v358_v18 = vpop.f32.mrf.mxu0 }
  0xd8   : > { %v359_v19 = vadd.f32 %v566_v14, %v358_v18 }
  0xd9   : > { %v584_v20 = vpop.f32.mrf.mxu0 }
  0xda   : > { %v363_v22 = vmax.f32 %v359_v19, 0.0 }
  0xdc   : > { %v364_v23 = vpack.c.bf16 %v363_v22, %v362_v21 }
  0xde   : > { %590 = vmatmul.mubr.msk.bf16.vlgmr.msra.gmra.mxu1 %vm378_vm4, %v364_v23 }
 0x19e   : > { %v416_v25 = vpop.f32.mrf.mxu1 }
 0x19f   : > { %v417_v26 = vadd.f32 %v568_v24, %v416_v25 }
 0x1a0   : > { %v591_v27 = vpop.f32.mrf.mxu1 }
 0x1a1   : > { %424 = vst.msk [vmem:[%s295_s29] sm:$0xff] %vm423_vm5, %v417_v26  ;;  %v433_v31 = vsel %vm423_vm5, %v417_v26, -inf }
 0x1a2   : > { %v419_v28 = vpop.f32.mrf.mxu1 }
 0x1a3   : > { %v420_v29 = vadd.f32 %v568_v24, %v419_v28 }
 0x1a4   : > { %v592_v30 = vpop.f32.mrf.mxu1 }
 0x1a5   : > { %425 = vst.msk [vmem:[%s295_s29 + $0x8] sm:$0xff] %vm423_vm5, %v420_v29  ;;  %v434_v32 = vsel %vm423_vm5, %v420_v29, -inf }
 0x1a6   : > { %v435_v33 = vmax.f32 %v433_v31, %v434_v32 }
 0x1a8   : > { %v436_v34 = vrot.slane %v435_v33, 4 }
 0x1aa   : > { %v437_v35 = vmax.f32 %v435_v33, %v436_v34 }
 0x1ac   : > { %v438_v36 = vrot.slane %v437_v35, 2 }
 0x1ae   : > { %v439_v37 = vmax.f32 %v437_v35, %v438_v36 }
 0x1b0   : > { %v440_v38 = vrot.slane %v439_v37, 1 }
 0x1b2   : > { %v441_v40 = vmax.f32 %v439_v37, %v440_v38 }
 0x1b4   : > { %v442_v41 = vmax.f32 %v432_v39, %v441_v40 }
 0x1b6   : > { %444 = vst.msk [vmem:[%s710_s30] sm:$0x1] %vm430_vm2, %v442_v41 }
 0x1b7 PF: > { %s17_s23 = sadd.s32 1, %s642_s23   ;;  %s761_s21 = smov %s638_s22 }
 0x1b8   : > { %p14_p5 = scmp.ge.s32.totalorder %s17_s23, 4   ;;  %s762_s22 = smov %s764_s24 }
 0x1ba   :  { %16 = sbr.rel (!%p14_p5) target bundleno = 2 (0x2), region = 86 }

// kernel: discriminator_fwd.5
= control target key start
LH: loop header
LB: loop body
LE: loop exit
PB: predicated region body
PF: predicated region fallthrough
CT: control target
= control target key end

     0   :  { %s677_s18 = smov 0   ;;  %s679_s19 = smov 0   ;;  %s892_s0 = inlined_call_operand.vmem [shape: f32[2,16,128], index: 0, kind: input, shape index: {}]   ;;  %s893_s1 = inlined_call_operand.vmem [shape: f32[128,128], index: 1, kind: input, shape index: {}]   ;;  %s894_s2 = inlined_call_operand.vmem [shape: f32[1,128], index: 2, kind: input, shape index: {}]   ;;  %s895_s3 = inlined_call_operand.vmem [shape: f32[128,256], index: 3, kind: input, shape index: {}]   ;;  %s896_s4 = inlined_call_operand.vmem [shape: f32[1,256], index: 4, kind: input, shape index: {}]   ;;  %s897_s5 = inlined_call_operand.vmem [shape: f32[2,1,256], index: 5, kind: output, shape index: {}]  }
   0x1   :  { %s681_s20 = smov 0  }
   0x2 LB: > { %s27_s21 = sadd.s32 1, %s636_s19  ;;  %p552_p0 = scmp.ge.s32.totalorder %s640_s20, 1  ;;  %s640_s20 = sphi %s681_s20, %s15_s20   ;;  %s636_s19 = sphi %s679_s19, %s901_s19   ;;  %s632_s18 = sphi %s677_s18, %s900_s18  }
   0x3   : > { %p29_p1 = scmp.ge.s32.totalorder %s27_s21, 2  ;;  %p206_p2 = scmp.lt.s32.totalorder %s640_s20, 3 }
   0x5   : > { %s903_s21 = smov (%p29_p1, %s27_s21), 0  ;;  %p207_p3 = pnand %p552_p0, %p206_p2 }
   0x6   : > { %p238_p4 = scmp.lt.s32.totalorder (!%p207_p3), %s632_s18, 1 }
   0x7   : > { %210 = sbr.rel (%p207_p3) target bundleno = 473 (0x1d9), region = 40 }
   0xc   : > { %v269_v0 = vld [vmem:[%s893_s1 + $0x70] sm:$0xff]  ;;  %v270_v1 = vld [vmem:[%s893_s1 + $0x78] sm:$0xff]  ;;  %v267_v2 = vld [vmem:[%s893_s1 + $0x60] sm:$0xff]  ;;  %v642_v3 = vmov 0.0   ;;  %vm643_vm0 = vmmov 0   ;;  %s905_s18 = smov (!%p238_p4, %s632_s18), 1 }
   0xd   : > { %569 = vmatprep.subr.bf16.mxu0 %v642_v3  ;;  %v278_v4 = vpack.c.bf16 %v270_v1, %v269_v0  ;;  %v268_v5 = vld [vmem:[%s893_s1 + $0x68] sm:$0xff]  ;;  %585 = vmatprep.mubr.msk.bf16.mxu0 %vm643_vm0, %v642_v3  ;;  %v265_v7 = vld [vmem:[%s893_s1 + $0x50] sm:$0xff]  ;;  %v266_v8 = vld [vmem:[%s893_s1 + $0x58] sm:$0xff]  ;;  %s559_s6 = sshll.u32 %s905_s18, 4  ;;  %s555_s15 = sshll.u32 %s905_s18, 1 }
   0xe   : > { %v277_v6 = vpack.c.bf16 %v268_v5, %v267_v2  ;;  %v359_v9 = vld [vmem:[%s895_s3 + $0xe8] sm:$0xff]  ;;  %v361_v10 = vld [vmem:[%s895_s3 + $0xf8] sm:$0xff]  ;;  %v263_v11 = vld [vmem:[%s893_s1 + $0x40] sm:$0xff]  ;;  %v276_v15 = vpack.c.bf16 %v266_v8, %v265_v7  ;;  %s245_s13 = scalar_lea.vmem %s892_s0, %s559_s6  ;;  %s867_s22 = scalar_lea.vmem %s897_s5, %s555_s15 }
   0xf   : > { %570 = vmatpush3.bf16.msra.mxu0 %v278_v4  ;;  %v264_v12 = vld [vmem:[%s893_s1 + $0x48] sm:$0xff]  ;;  %v377_v13 = vpack.c.bf16 %v361_v10, %v359_v9  ;;  %v358_v14 = vld [vmem:[%s895_s3 + $0xe0] sm:$0xff]  ;;  %v360_v16 = vld [vmem:[%s895_s3 + $0xf0] sm:$0xff] }
  0x10   : > { %571 = vmatprep.subr.bf16.mxu0 %v642_v3  ;;  %v355_v17 = vld [vmem:[%s895_s3 + $0xc8] sm:$0xff]  ;;  %v357_v18 = vld [vmem:[%s895_s3 + $0xd8] sm:$0xff]  ;;  %v376_v19 = vpack.c.bf16 %v360_v16, %v358_v14  ;;  %v354_v21 = vld [vmem:[%s895_s3 + $0xc0] sm:$0xff]  ;;  %v275_v26 = vpack.c.bf16 %v264_v12, %v263_v11  ;;  %v644_v12 = vmov 0  }
  0x11   : > { %390 = vmatprep.subr.bf16.mxu1 %v377_v13  ;;  %v375_v20 = vpack.c.bf16 %v357_v18, %v355_v17  ;;  %v356_v22 = vld [vmem:[%s895_s3 + $0xd0] sm:$0xff]  ;;  %v351_v23 = vld [vmem:[%s895_s3 + $0xa8] sm:$0xff]  ;;  %v353_v24 = vld [vmem:[%s895_s3 + $0xb8] sm:$0xff]  ;;  %422 = vmatprep.mubr.bf16.mxu1 %v644_v12 }
  0x12   : > { %391 = vmatpush1.bf16.msra.mxu1 %v376_v19  ;;  %v374_v25 = vpack.c.bf16 %v356_v22, %v354_v21  ;;  %v261_v27 = vld [vmem:[%s893_s1 + $0x30] sm:$0xff]  ;;  %v373_v28 = vpack.c.bf16 %v353_v24, %v351_v23  ;;  %v350_v29 = vld [vmem:[%s895_s3 + $0xa0] sm:$0xff]  ;;  %v262_v31 = vld [vmem:[%s893_s1 + $0x38] sm:$0xff]  ;;  %v380_v23 = vlaneseq }
  0x13   : > { %572 = vmatpush3.bf16.msra.mxu0 %v277_v6  ;;  %392 = vmatprep.subr.bf16.mxu1 %v375_v20  ;;  %v352_v30 = vld [vmem:[%s895_s3 + $0xb0] sm:$0xff]  ;;  %v347_v32 = vld [vmem:[%s895_s3 + $0x88] sm:$0xff]  ;;  %v349_v33 = vld [vmem:[%s895_s3 + $0x98] sm:$0xff]  ;;  %v274_v35 = vpack.c.bf16 %v262_v31, %v261_v27 }
  0x14   : > { %573 = vmatprep.subr.bf16.mxu0 %v642_v3  ;;  %v372_v34 = vpack.c.bf16 %v352_v30, %v350_v29  ;;  %v259_v36 = vld [vmem:[%s893_s1 + $0x20] sm:$0xff]  ;;  %v371_v37 = vpack.c.bf16 %v349_v33, %v347_v32  ;;  %v348_v39 = vld [vmem:[%s895_s3 + $0x90] sm:$0xff]  ;;  %v260_v40 = vld [vmem:[%s893_s1 + $0x28] sm:$0xff]  ;;  %vm869_vm1 = vcmp.lt.s32.totalorder %v380_v23, 256 }
  0x15   : > { %v346_v38 = vld [vmem:[%s895_s3 + $0x80] sm:$0xff]  ;;  %v343_v41 = vld [vmem:[%s895_s3 + $0x68] sm:$0xff]  ;;  %v345_v42 = vld [vmem:[%s895_s3 + $0x78] sm:$0xff]  ;;  %v273_v44 = vpack.c.bf16 %v260_v40, %v259_v36 }
  0x16   : > { %393 = vmatpush1.bf16.msra.mxu1 %v374_v25  ;;  %v370_v43 = vpack.c.bf16 %v348_v39, %v346_v38  ;;  %v257_v45 = vld [vmem:[%s893_s1 + $0x10] sm:$0xff]  ;;  %v369_v46 = vpack.c.bf16 %v345_v42, %v343_v41  ;;  %v342_v47 = vld [vmem:[%s895_s3 + $0x60] sm:$0xff]  ;;  %v258_v49 = vld [vmem:[%s893_s1 + $0x18] sm:$0xff]  ;;  %v645_v25 = vmov -inf  }
  0x17   : > { %574 = vmatpush3.bf16.msra.mxu0 %v276_v15  ;;  %394 = vmatprep.subr.bf16.mxu1 %v373_v28  ;;  %v344_v48 = vld [vmem:[%s895_s3 + $0x70] sm:$0xff]  ;;  %v339_v50 = vld [vmem:[%s895_s3 + $0x48] sm:$0xff]  ;;  %v341_v51 = vld [vmem:[%s895_s3 + $0x58] sm:$0xff]  ;;  %v272_v53 = vpack.c.bf16 %v258_v49, %v257_v45  ;;  %441 = vst.msk [vmem:[%s867_s22] sm:$0x3] %vm869_vm1, %v645_v25 }
  0x18   : > { %575 = vmatprep.subr.bf16.mxu0 %v642_v3  ;;  %v368_v52 = vpack.c.bf16 %v344_v48, %v342_v47  ;;  %v367_v54 = vpack.c.bf16 %v341_v51, %v339_v50  ;;  %v255_v55 = vld [vmem:[%s893_s1] sm:$0xff]  ;;  %v256_v56 = vld [vmem:[%s893_s1 + $0x8] sm:$0xff]  ;;  %v340_v62 = vld [vmem:[%s895_s3 + $0x50] sm:$0xff]  ;;  %v646_v45 = vmov 1966171168  }
  0x19   : > { %v271_v57 = vpack.c.bf16 %v256_v56, %v255_v55  ;;  %v252_v58 = vld [vmem:[%s245_s13] sm:$0xff]  ;;  %v253_v59 = vld [vmem:[%s245_s13 + $0x8] sm:$0xff]  ;;  %v337_v1 = vld [vmem:[%s895_s3 + $0x38] sm:$0xff] }
  0x1a   : > { %395 = vmatpush1.bf16.msra.mxu1 %v372_v34  ;;  %v254_v60 = vpack.c.bf16 %v253_v59, %v252_v58  ;;  %v338_v61 = vld [vmem:[%s895_s3 + $0x40] sm:$0xff]  ;;  %v335_v0 = vld [vmem:[%s895_s3 + $0x28] sm:$0xff]  ;;  %v336_v4 = vld [vmem:[%s895_s3 + $0x30] sm:$0xff] }
  0x1b   : > { %576 = vmatpush3.bf16.msra.mxu0 %v275_v26  ;;  %396 = vmatprep.subr.bf16.mxu1 %v371_v37  ;;  %v366_v63 = vpack.c.bf16 %v340_v62, %v338_v61  ;;  %v365_v2 = vpack.c.bf16 %v337_v1, %v335_v0  ;;  %v331_v6 = vld [vmem:[%s895_s3 + $0x8] sm:$0xff]  ;;  %v333_v7 = vld [vmem:[%s895_s3 + $0x18] sm:$0xff]  ;;  %v330_v9 = vld [vmem:[%s895_s3] sm:$0xff]  ;;  %v381_v26 = vshrl.u32 %v380_v23, 7 }
  0x1c   : > { %577 = vmatprep.subr.bf16.mxu0 %v642_v3  ;;  %v363_v8 = vpack.c.bf16 %v333_v7, %v331_v6  ;;  %v332_v10 = vld [vmem:[%s895_s3 + $0x10] sm:$0xff]  ;;  %v556_v13 = vld [vmem:[%s894_s2] ss:$0 sm:$0xff] }
  0x1d   : > { %v362_v11 = vpack.c.bf16 %v332_v10, %v330_v9  ;;  %v382_v27 = vsub.s32 0, %v381_v26  ;;  %v378_v28 = vld [vmem:[%s896_s4] sm:$0x3]  ;;  %v386_v29 = vsub.s32 1, %v381_v26 }
  0x1e   : > { %397 = vmatpush1.bf16.msra.mxu1 %v370_v43 }
  0x1f   : > { %578 = vmatpush3.bf16.msra.mxu0 %v274_v35  ;;  %398 = vmatprep.subr.bf16.mxu1 %v369_v46  ;;  %v383_v31 = vrot.slane %v378_v28, %v382_v27  ;;  %v387_v33 = vrot.slane %v378_v28, %v386_v29  ;;  %v461_v46 = vunpack.c.l.s4 %v646_v45 }
  0x20   : > { %579 = vmatprep.subr.bf16.mxu0 %v642_v3 }
  0x21   : > { %v462_v51 = vunpack.c.0.s8 %v461_v46 }
  0x22   : > { %399 = vmatpush1.bf16.msra.mxu1 %v368_v52 }
  0x23   : > { %580 = vmatpush3.bf16.msra.mxu0 %v273_v44  ;;  %400 = vmatprep.subr.bf16.mxu1 %v367_v54  ;;  %v465_v55 = vsub.s32 %v462_v51, %v381_v26 }
  0x24   : > { %581 = vmatprep.subr.bf16.mxu0 %v642_v3 }
  0x26   : > { %401 = vmatpush1.bf16.msra.mxu1 %v366_v63 }
  0x27   : > { %582 = vmatpush3.bf16.msra.mxu0 %v272_v53  ;;  %402 = vmatprep.subr.bf16.mxu1 %v365_v2 }
  0x28   : > { %583 = vmatprep.subr.bf16.mxu0 %v642_v3  ;;  %v334_v3 = vld [vmem:[%s895_s3 + $0x20] sm:$0xff] }
  0x29   : > { %v364_v5 = vpack.c.bf16 %v336_v4, %v334_v3 }
  0x2b   : > { %584 = vmatpush3.bf16.msra.mxu0 %v271_v57  ;;  %403 = vmatpush1.bf16.msra.mxu1 %v364_v5 }
  0x2c   : > { %404 = vmatprep.subr.bf16.mxu1 %v363_v8 }
  0x2e   : > { %586 = vmatmul.mubr.bf16.vlgmr.msra.gmra.mxu0 %v254_v60  ;;  %v442_v60 = vld [vmem:[%s867_s22] sm:$0x3] }
  0x2f   : > { %405 = vmatpush1.bf16.msra.mxu1 %v362_v11 }
  0xee   : > { %v320_v14 = vpop.f32.mrf.mxu0 }
  0xef   : > { %v321_v16 = vadd.f32 %v556_v13, %v320_v14 }
  0xf0   : > { %v587_v15 = vpop.f32.mrf.mxu0 }
  0xf1   : > { %v327_v20 = vmax.f32 %v321_v16, 0.0 }
  0xf2   : > { %v323_v17 = vpop.f32.mrf.mxu0 }
  0xf3   : > { %v324_v18 = vadd.f32 %v556_v13, %v323_v17 }
  0xf4   : > { %v588_v19 = vpop.f32.mrf.mxu0 }
  0xf5   : > { %v328_v21 = vmax.f32 %v324_v18, 0.0 }
  0xf7   : > { %v329_v22 = vpack.c.bf16 %v328_v21, %v327_v20 }
  0xf9   : > { %423 = vmatmul.mubr.bf16.vlgmr.msra.gmra.mxu1 %v329_v22 }
 0x1b9   : > { %v424_v30 = vpop.f32.mrf.mxu1 }
 0x1ba   : > { %v425_v35 = vadd.f32 %v424_v30, %v383_v31 }
 0x1bb   : > { %v426_v32 = vpop.f32.mrf.mxu1 }
 0x1bc   : > { %v427_v38 = vadd.f32 %v426_v32, %v387_v33 }
 0x1bd   : > { %v428_v34 = vpop.f32.mrf.mxu1 }
 0x1be   : > { %v429_v36 = vadd.f32 %v428_v34, %v383_v31 }
 0x1bf   : > { %v430_v37 = vpop.f32.mrf.mxu1 }
 0x1c0   : > { %v443_v39 = vmax.f32 %v425_v35, %v429_v36  ;;  %v431_v40 = vadd.f32 %v430_v37, %v387_v33 }
 0x1c2   : > { %v444_v41 = vrot.slane %v443_v39, 4  ;;  %v450_v42 = vmax.f32 %v427_v38, %v431_v40 }
 0x1c4   : > { %v445_v43 = vmax.f32 %v443_v39, %v444_v41  ;;  %v451_v44 = vrot.slane %v450_v42, 4 }
 0x1c6   : > { %v446_v47 = vrot.slane %v445_v43, 2  ;;  %v452_v48 = vmax.f32 %v450_v42, %v451_v44 }
 0x1c8   : > { %v447_v49 = vmax.f32 %v445_v43, %v446_v47  ;;  %v453_v50 = vrot.slane %v452_v48, 2 }
 0x1ca   : > { %v448_v52 = vrot.slane %v447_v49, 1  ;;  %v454_v53 = vmax.f32 %v452_v48, %v453_v50 }
 0x1cc   : > { %v455_v54 = vrot.slane %v454_v53, 1  ;;  %v449_v56 = vmax.f32 %v447_v49, %v448_v52 }
 0x1ce   : > { %v456_v57 = vmax.f32 %v454_v53, %v455_v54 }
 0x1d0   : > { %v459_v58 = vcombine.low %v449_v56, %v456_v57 }
 0x1d2   : > { %v466_v59 = vrot.slane %v459_v58, %v465_v55 }
 0x1d4   : > { %v473_v61 = vrot.slane %v466_v59, %v465_v55 }
 0x1d6   : > { %v475_v62 = vmax.f32 %v442_v60, %v473_v61 }
 0x1d8   : > { %480 = vst.msk [vmem:[%s867_s22] sm:$0x3] %vm869_vm1, %v475_v62 }
 0x1d9 PF: > { %s15_s20 = sadd.s32 1, %s640_s20   ;;  %s900_s18 = smov %s636_s19 }
 0x1da   : > { %p12_p5 = scmp.ge.s32.totalorder %s15_s20, 4   ;;  %s901_s19 = smov %s903_s21 }
 0x1dc   :  { %14 = sbr.rel (!%p12_p5) target bundleno = 2 (0x2), region = 74 }

// kernel: discriminator_fwd.4
= control target key start
LH: loop header
LB: loop body
LE: loop exit
PB: predicated region body
PF: predicated region fallthrough
CT: control target
= control target key end

     0   :  { %s1089_s11 = smov 0   ;;  %s1091_s12 = smov 0   ;;  %s1263_s0 = inlined_call_operand.vmem [shape: f32[2,16,64], index: 0, kind: input, shape index: {}]   ;;  %s1264_s1 = inlined_call_operand.vmem [shape: f32[2,1,64], index: 1, kind: input, shape index: {}]   ;;  %s1265_s2 = inlined_call_operand.vmem [shape: f32[64,32], index: 2, kind: input, shape index: {}]   ;;  %s1266_s3 = inlined_call_operand.vmem [shape: f32[2,1,32], index: 3, kind: input, shape index: {}]   ;;  %s1267_s4 = inlined_call_operand.vmem [shape: f32[64,32], index: 4, kind: input, shape index: {}]   ;;  %s1268_s5 = inlined_call_operand.vmem [shape: f32[2,1,32], index: 5, kind: input, shape index: {}]   ;;  %s1269_s6 = inlined_call_operand.vmem [shape: f32[64,128], index: 6, kind: input, shape index: {}]   ;;  %s1270_s7 = inlined_call_operand.vmem [shape: f32[2,1,128], index: 7, kind: input, shape index: {}]   ;;  %s1271_s8 = inlined_call_operand.<no memory space> [shape: f32[1,1], index: 8, kind: input, shape index: {}]   ;;  %s1272_s9 = inlined_call_operand.vmem [shape: f32[2,16,128], index: 9, kind: output, shape index: {}]  }
   0x1   :  { %14 = sst [smem:[#allocation3]] %s1271_s8  ;;  %s1093_s13 = smov 0  }
   0x2 LB: > { %s32_s8 = sadd.s32 1, %s1027_s12  ;;  %p888_p0 = scmp.ge.s32.totalorder %s1031_s13, 1  ;;  %s1031_s13 = sphi %s1093_s13, %s20_s13   ;;  %s1027_s12 = sphi %s1091_s12, %s1274_s12   ;;  %s1023_s11 = sphi %s1089_s11, %s1273_s11  }
   0x3   : > { %p34_p1 = scmp.ge.s32.totalorder %s32_s8, 2  ;;  %p332_p2 = scmp.lt.s32.totalorder %s1031_s13, 3 }
   0x5   : > { %s1276_s8 = smov (%p34_p1, %s32_s8), 0  ;;  %p333_p3 = pnand %p888_p0, %p332_p2 }
   0x6   : > { %p380_p4 = scmp.lt.s32.totalorder (!%p333_p3), %s1023_s11, 1  ;;  %s1035_s23 = smov (!%p333_p3), 64  }
   0x7   : > { %336 = sbr.rel (%p333_p3) target bundleno = 965 (0x3c5), region = 56 }
   0xc   : > { %v416_v0 = vld [vmem:[%s1265_s2 + $0x30] sm:$0xff]  ;;  %v417_v1 = vld [vmem:[%s1265_s2 + $0x38] sm:$0xff]  ;;  %v414_v2 = vld [vmem:[%s1265_s2 + $0x20] sm:$0xff]  ;;  %v1033_v3 = vmov 0.0   ;;  %vm1034_vm0 = vmmov 0   ;;  %s1278_s11 = smov (!%p380_p4, %s1023_s11), 1 }
   0xd   : > { %925 = vmatprep.subr.bf16.mxu0 %v1033_v3  ;;  %v421_v4 = vpack.c.bf16 %v417_v1, %v416_v0  ;;  %v415_v5 = vld [vmem:[%s1265_s2 + $0x28] sm:$0xff]  ;;  %937 = vmatprep.subr.bf16.mxu1 %v1033_v3  ;;  %v492_v6 = vld [vmem:[%s1267_s4 + $0x30] sm:$0xff]  ;;  %v493_v7 = vld [vmem:[%s1267_s4 + $0x38] sm:$0xff]  ;;  %s904_s16 = sshll.u32 %s1278_s11, 4  ;;  %vm429_vm1 = vcmask 523264   ;;  %s390_s17 = scalar_lea.vmem %s1266_s3, %s1278_s11  ;;  %vm476_vm2 = vcmask 261120  }
   0xe   : > { %933 = vmatprep.mubr.msk.bf16.mxu0 %vm1034_vm0, %v1033_v3  ;;  %945 = vmatprep.mubr.msk.bf16.mxu1 %vm1034_vm0, %v1033_v3  ;;  %v420_v8 = vpack.c.bf16 %v415_v5, %v414_v2  ;;  %v497_v9 = vpack.c.bf16 %v493_v7, %v492_v6  ;;  %v490_v10 = vld [vmem:[%s1267_s4 + $0x20] sm:$0xff]  ;;  %v491_v11 = vld [vmem:[%s1267_s4 + $0x28] sm:$0xff]  ;;  %v412_v12 = vld [vmem:[%s1265_s2 + $0x10] sm:$0xff]  ;;  %s384_s27 = scalar_lea.vmem %s1263_s0, %s904_s16  ;;  %s393_s20 = scalar_lea.vmem %s1268_s5, %s1278_s11  ;;  %vm666_vm3 = vcmask 130048  }
   0xf   : > { %926 = vmatpush3.bf16.msra.mxu0 %v421_v4  ;;  %v413_v13 = vld [vmem:[%s1265_s2 + $0x18] sm:$0xff]  ;;  %v496_v14 = vpack.c.bf16 %v491_v11, %v490_v10  ;;  %v488_v15 = vld [vmem:[%s1267_s4 + $0x10] sm:$0xff]  ;;  %v410_v18 = vld [vmem:[%s1265_s2] sm:$0xff]  ;;  %s387_s22 = scalar_lea.vmem %s1264_s1, %s1278_s11  ;;  %s396_s26 = scalar_lea.vmem %s1270_s7, %s1278_s11 }
  0x10   : > { %927 = vmatprep.subr.bf16.mxu0 %v1033_v3  ;;  %938 = vmatpush3.bf16.msra.mxu1 %v497_v9  ;;  %v489_v16 = vld [vmem:[%s1267_s4 + $0x18] sm:$0xff]  ;;  %v419_v17 = vpack.c.bf16 %v413_v13, %v412_v12  ;;  %v411_v19 = vld [vmem:[%s1265_s2 + $0x8] sm:$0xff]  ;;  %v486_v21 = vld [vmem:[%s1267_s4] sm:$0xff]  ;;  %s401_s30 = scalar_lea.vmem %s1272_s9, %s904_s16 }
  0x11   : > { %939 = vmatprep.subr.bf16.mxu1 %v1033_v3  ;;  %v495_v20 = vpack.c.bf16 %v489_v16, %v488_v15  ;;  %v487_v22 = vld [vmem:[%s1267_s4 + $0x8] sm:$0xff]  ;;  %v418_v23 = vpack.c.bf16 %v411_v19, %v410_v18  ;;  %v1173_v24 = vld [vmem:[%s384_s27] sm:$0xff]  ;;  %v558_v51 = vld [vmem:[%s1269_s6 + $0x30] sm:$0xff] }
  0x12   : > { %v1175_v25 = vld [vmem:[%s384_s27 + $0x8] sm:$0xff]  ;;  %v494_v26 = vpack.c.bf16 %v487_v22, %v486_v21  ;;  %v893_v28 = vld [vmem:[%s390_s17] ss:$0 sm:$0xff]  ;;  %v559_v52 = vld [vmem:[%s1269_s6 + $0x38] sm:$0xff]  ;;  %s773_s27 = sld [smem:[#allocation3]] }
  0x13   : > { %928 = vmatpush3.bf16.msra.mxu0 %v420_v8  ;;  %v409_v27 = vpack.c.bf16 %v1175_v25, %v1173_v24  ;;  %v895_v41 = vld [vmem:[%s393_s20] ss:$0 sm:$0xff]  ;;  %v563_v54 = vpack.c.bf16 %v559_v52, %v558_v51  ;;  %v557_v55 = vld [vmem:[%s1269_s6 + $0x28] sm:$0xff]  ;;  %v554_v57 = vld [vmem:[%s1269_s6 + $0x10] sm:$0xff] }
  0x14   : > { %929 = vmatprep.subr.bf16.mxu0 %v1033_v3  ;;  %940 = vmatpush3.bf16.msra.mxu1 %v496_v14  ;;  %v556_v53 = vld [vmem:[%s1269_s6 + $0x20] sm:$0xff]  ;;  %v555_v58 = vld [vmem:[%s1269_s6 + $0x18] sm:$0xff]  ;;  %v553_v61 = vld [vmem:[%s1269_s6 + $0x8] sm:$0xff] }
  0x15   : > { %941 = vmatprep.subr.bf16.mxu1 %v1033_v3  ;;  %v562_v56 = vpack.c.bf16 %v557_v55, %v556_v53  ;;  %v561_v59 = vpack.c.bf16 %v555_v58, %v554_v57  ;;  %v552_v60 = vld [vmem:[%s1269_s6] sm:$0xff] }
  0x16   : > { %v560_v62 = vpack.c.bf16 %v553_v61, %v552_v60 }
  0x17   : > { %930 = vmatpush3.bf16.msra.mxu0 %v419_v17 }
  0x18   : > { %931 = vmatprep.subr.bf16.mxu0 %v1033_v3  ;;  %942 = vmatpush3.bf16.msra.mxu1 %v495_v20  ;;  %v901_v20 = vld [vmem:[%s387_s22] ss:$0 sm:$0xff] }
  0x19   : > { %943 = vmatprep.subr.bf16.mxu1 %v1033_v3 }
  0x1b   : > { %932 = vmatpush3.bf16.msra.mxu0 %v418_v23  ;;  %v897_v23 = vld [vmem:[%s396_s26] ss:$0 sm:$0xff] }
  0x1c   : > { %949 = vmatprep.subr.bf16.mxu0 %v1033_v3  ;;  %944 = vmatpush3.bf16.msra.mxu1 %v494_v26 }
  0x1d   : > { %961 = vmatprep.subr.bf16.mxu1 %v1033_v3 }
  0x1e   : > { %934 = vmatmul.mubr.msk.bf16.vlgmr.msra.gmra.mxu0 %vm429_vm1, %v409_v27 }
  0x1f   : > { %957 = vmatprep.mubr.msk.bf16.mxu0 %vm1034_vm0, %v1033_v3  ;;  %946 = vmatmul.mubr.msk.bf16.vlgmr.msra.gmra.mxu1 %vm429_vm1, %v409_v27 }
  0x20   : > { %963 = vmatprep.mubr.msk.bf16.mxu1 %vm1034_vm0, %v1033_v3  ;;  %950 = vmatpush3.bf16.msra.mxu0 %v563_v54 }
  0x21   : > { %951 = vmatprep.subr.bf16.mxu0 %v1033_v3 }
  0x24   : > { %952 = vmatpush3.bf16.msra.mxu0 %v562_v56 }
  0x25   : > { %953 = vmatprep.subr.bf16.mxu0 %v1033_v3 }
  0x28   : > { %954 = vmatpush3.bf16.msra.mxu0 %v561_v59 }
  0x29   : > { %955 = vmatprep.subr.bf16.mxu0 %v1033_v3 }
  0x2c   : > { %956 = vmatpush3.bf16.msra.mxu0 %v560_v62 }
  0x2f   : > { %958 = vmatmul.mubr.msk.bf16.vlgmr.msra.gmra.mxu0 %vm429_vm1, %v409_v27 }
  0xde   : > { %v467_v29 = vpop.f32.mrf.mxu0 }
  0xdf   : > { %v468_v30 = vadd.f32 %v893_v28, %v467_v29  ;;  %v543_v32 = vpop.f32.mrf.mxu1 }
  0xe0   : > { %v935_v31 = vpop.f32.mrf.mxu0  ;;  %v544_v44 = vadd.f32 %v895_v41, %v543_v32 }
  0xe1   : > { %v474_v33 = vmax.f32 %v468_v30, 0.0  ;;  %v947_v35 = vpop.f32.mrf.mxu1 }
  0xe2   : > { %v470_v34 = vpop.f32.mrf.mxu0  ;;  %v550_v48 = vmax.f32 %v544_v44, 0.0 }
  0xe3   : > { %477 = vst.msk [vmem:[#allocation2] sm:$0xff] %vm476_vm2, %v474_v33  ;;  %v471_v36 = vadd.f32 %v893_v28, %v470_v34  ;;  %v546_v38 = vpop.f32.mrf.mxu1 }
  0xe4   : > { %v936_v37 = vpop.f32.mrf.mxu0  ;;  %v547_v45 = vadd.f32 %v895_v41, %v546_v38  ;;  %v776_v38 = vstv %s773_s27 }
  0xe5   : > { %v475_v39 = vmax.f32 %v471_v36, 0.0  ;;  %v948_v40 = vpop.f32.mrf.mxu1 }
  0xe6   : > { %v551_v49 = vmax.f32 %v547_v45, 0.0 }
  0xe7   : > { %478 = vst.msk [vmem:[#allocation2 + $0x8] sm:$0xff] %vm476_vm2, %v475_v39 }
  0xe8   : > { %v614_v50 = vpack.c.bf16 %v551_v49, %v550_v48 }
  0xea   : > { %v615_v42 = vld [vmem:[#allocation2] sm:$0xff] }
  0xee   : > { %v616_v43 = vld [vmem:[#allocation2 + $0x8] sm:$0xff] }
  0xef   : > { %v617_v46 = vpack.c.bf16 %v616_v43, %v615_v42  ;;  %v605_v16 = vpop.f32.mrf.mxu0 }
  0xf0   : > { %v606_v26 = vadd.f32 %v897_v23, %v605_v16 }
  0xf1   : > { %v623_v47 = vsel %vm476_vm2, %v617_v46, 0  ;;  %v959_v17 = vpop.f32.mrf.mxu0 }
  0xf2   : > { %962 = vmatpush3.bf16.xpose.msra.mxu1 %v623_v47  ;;  %v612_v28 = vmax.f32 %v606_v26, 0.0 }
  0xf3   : > { %967 = vmatprep.subr.bf16.mxu1 %v1033_v3  ;;  %v608_v18 = vpop.f32.mrf.mxu0 }
  0xf4   : > { %v609_v27 = vadd.f32 %v897_v23, %v608_v18 }
  0xf5   : > { %v960_v19 = vpop.f32.mrf.mxu0 }
  0xf6   : > { %v613_v30 = vmax.f32 %v609_v27, 0.0 }
  0xf9   : > { %964 = vmatmul.mubr.msk.bf16.vlgmr.msra.gmra.mxu1 %vm476_vm2, %v614_v50 }
  0xfa   : > { %969 = vmatprep.mubr.msk.bf16.mxu1 %vm1034_vm0, %v1033_v3 }
 0x1b9   : > { %v659_v63 = vpop.f32.mrf.mxu1 }
 0x1ba   : > { %v667_v0 = vsel %vm666_vm3, %v659_v63, -inf }
 0x1bb   : > { %668 = vmax.xlane.f32.xlu0 %v667_v0  ;;  %v965_v1 = vpop.f32.mrf.mxu1 }
 0x1bd   : > { %v662_v2 = vpop.f32.mrf.mxu1 }
 0x1be   : > { %v670_v4 = vsel %vm666_vm3, %v662_v2, -inf }
 0x1bf   : > { %671 = vmax.xlane.f32.xlu0 %v670_v4  ;;  %v966_v5 = vpop.f32.mrf.mxu1 }
 0x244   : > { %v669_v6 = vpop.xlane.xlu0 %668 }
 0x245   : > { %v673_v7 = vsub.f32 %v659_v63, %v669_v6 }
 0x247   : > { %v675_v8 = vmul.f32 1.442695, %v673_v7 }
 0x248   : > { %v672_v9 = vpop.xlane.xlu0 %671 }
 0x249   : > { %1001 = vpow2.f32 %v675_v8  ;;  %v674_v3 = vsub.f32 %v662_v2, %v672_v9 }
 0x24b   : > { %v677_v10 = vmul.f32 1.442695, %v674_v3 }
 0x24d   : > { %1003 = vpow2.f32 %v677_v10 }
 0x256   : > { %v1002_v11 = vpop.eup %1001 }
 0x257   : > { %v679_v12 = vsel %vm666_vm3, %v1002_v11, 0.0 }
 0x258   : > { %680 = vadd.xlane.f32.xlu1 %v679_v12 }
 0x25a   : > { %v1004_v13 = vpop.eup %1003 }
 0x25b   : > { %v682_v14 = vsel %vm666_vm3, %v1004_v13, 0.0  ;;  %v691_v15 = vpack.c.bf16 %v1004_v13, %v1002_v11 }
 0x25c   : > { %683 = vadd.xlane.f32.xlu1 %v682_v14 }
 0x25d   : > { %693 = vxpose.xlu0.c.b16.start.end [1/1] (short) (narrow) %v691_v15, 16 }
 0x26d   : > { %768 = vrot.lane.b32.xlu1 %v901_v20, %s1035_s23 }
 0x2bf   : > { %v701_v35 = vpop.trf.xlu0 }
 0x2e1   : > { %v681_v21 = vpop.xlane.xlu1 %680 }
 0x2e2   : > { %1005 = vrcp.f32 %v681_v21 }
 0x2e5   : > { %v684_v22 = vpop.xlane.xlu1 %683 }
 0x2e6   : > { %1007 = vrcp.f32 %v684_v22 }
 0x2e9   : > { %v769_v36 = vpop.permute.xlu1 %768 }
 0x2ea   : > { %v771_v40 = vsel %vm429_vm1, %v1173_v24, %v769_v36  ;;  %v772_v45 = vsel %vm429_vm1, %v1175_v25, %v769_v36 }
 0x2ef   : > { %v1006_v29 = vpop.eup %1005 }
 0x2f0   : > { %v687_v32 = vmul.f32 %v1006_v29, %v612_v28 }
 0x2f3   : > { %v1008_v31 = vpop.eup %1007 }
 0x2f4   : > { %v688_v33 = vmul.f32 %v1008_v31, %v613_v30 }
 0x2f6   : > { %v692_v34 = vpack.c.bf16 %v688_v33, %v687_v32 }
 0x2f8   : > { %968 = vmatpush3.bf16.msra.mxu1 %v692_v34 }
 0x2fb   : > { %970 = vmatmul.mubr.msk.bf16.vlgmr.msra.gmra.mxu1 %vm666_vm3, %v701_v35 }
 0x3bb   : > { %v746_v37 = vpop.f32.mrf.mxu1 }
 0x3bc   : > { %v777_v41 = vmul.f32 %v776_v38, %v746_v37 }
 0x3bd   : > { %v971_v39 = vpop.f32.mrf.mxu1 }
 0x3be   : > { %v779_v43 = vadd.f32 %v777_v41, %v771_v40 }
 0x3bf   : > { %v749_v42 = vpop.f32.mrf.mxu1 }
 0x3c0   : > { %v778_v46 = vmul.f32 %v776_v38, %v749_v42  ;;  %781 = vst [vmem:[%s401_s30] sm:$0xff] %v779_v43 }
 0x3c1   : > { %v972_v44 = vpop.f32.mrf.mxu1 }
 0x3c2   : > { %v780_v47 = vadd.f32 %v778_v46, %v772_v45 }
 0x3c4   : > { %782 = vst [vmem:[%s401_s30 + $0x8] sm:$0xff] %v780_v47 }
 0x3c5 PF: > { %s20_s13 = sadd.s32 1, %s1031_s13   ;;  %s1273_s11 = smov %s1027_s12 }
 0x3c6   : > { %p17_p5 = scmp.ge.s32.totalorder %s20_s13, 4   ;;  %s1274_s12 = smov %s1276_s8 }
 0x3c8   :  { %19 = sbr.rel (!%p17_p5) target bundleno = 2 (0x2), region = 107 }

</bundles_post_ra>
